<compile_context>
chip_gen: v7x
topology: tpu7x:2x2x1
jax: 0.10.0
libtpu: 0.0.40
codegen_flags: <defaults>
</compile_context>

<pallas_src>
import functools

import jax
import jax.numpy as jnp
from jax.experimental import pallas as pl
from jax.experimental.pallas import tpu as pltpu

_LANE = 128            # lane width (last dim)
_MiB = 1024 * 1024


# --------------------------------------------------------------------------- #
# Kernel
# --------------------------------------------------------------------------- #
def _block_kernel(x_ref, adj_ref,
                  w1_rel_ref, w1_root_ref, b1_ref,
                  w2_rel_ref, w2_root_ref, b2_ref,
                  wl1_ref, wl2_ref, bl_ref,
                  out_ref, *, ones_col, agg_dtype):
    bt, n, fp = x_ref.shape
    hp = w1_rel_ref.shape[1]
    op = w2_rel_ref.shape[1]

    x = x_ref[...]                        # (Bt, N, Fp) f32; lane `ones_col` == 1.0
    adj = adj_ref[...]                    # (Bt, N, N) in agg_dtype (bf16 by default)

    # ---- conv1 aggregation on the MXU (bf16 inputs, f32 accumulate).
    # The all-ones padded lane of x makes column `ones_col` of raw1 equal to
    # the adjacency row-sum, so the degree comes out of the MXU for free.
    raw1 = jnp.einsum("bij,bjf->bif", adj, x.astype(agg_dtype),
                      preferred_element_type=jnp.float32)            # (Bt, N, Fp)
    deg = raw1[..., ones_col:ones_col + 1]                           # (Bt, N, 1)
    inv_deg = pl.reciprocal(jnp.maximum(deg, 1.0), approx=True)

    x_2d = x.reshape(bt * n, fp)
    raw1_2d = raw1.reshape(bt * n, fp)
    inv_2d = inv_deg.reshape(bt * n, 1)

    # Row scaling commutes with right-multiplication: scale the narrower tensor.
    if hp <= fp:
        rel1 = jnp.dot(raw1_2d, w1_rel_ref[...],
                       preferred_element_type=jnp.float32) * inv_2d
    else:
        rel1 = jnp.dot(raw1_2d * inv_2d, w1_rel_ref[...],
                       preferred_element_type=jnp.float32)
    x1 = jnp.maximum(
        rel1
        + jnp.dot(x_2d, w1_root_ref[...], preferred_element_type=jnp.float32)
        + b1_ref[...],
        0.0)                                                          # (Bt*N, Hp)

    # ---- conv2: DenseSAGEConv(H -> O) ----
    raw2 = jnp.einsum("bij,bjh->bih", adj,
                      x1.reshape(bt, n, hp).astype(agg_dtype),
                      preferred_element_type=jnp.float32)             # (Bt, N, Hp)
    raw2_2d = raw2.reshape(bt * n, hp)
    if op <= hp:
        rel2 = jnp.dot(raw2_2d, w2_rel_ref[...],
                       preferred_element_type=jnp.float32) * inv_2d
    else:
        rel2 = jnp.dot(raw2_2d * inv_2d, w2_rel_ref[...],
                       preferred_element_type=jnp.float32)
    x2 = jnp.maximum(
        rel2
        + jnp.dot(x1, w2_root_ref[...], preferred_element_type=jnp.float32)
        + b2_ref[...],
        0.0)                                                          # (Bt*N, Op)

    # ---- JumpingKnowledge('cat') + final Linear, as a split matmul ----
    out = (jnp.dot(x1, wl1_ref[...], preferred_element_type=jnp.float32)
           + jnp.dot(x2, wl2_ref[...], preferred_element_type=jnp.float32)
           + bl_ref[...])
    out_ref[...] = out.reshape(bt, n, op)


# --------------------------------------------------------------------------- #
# Wrapper helpers
# --------------------------------------------------------------------------- #
def _round_up(v, m):
    return v + (-v) % m


def _pad_axis(a, axis, target):
    pad = target - a.shape[axis]
    if pad == 0:
        return a
    widths = [(0, 0)] * a.ndim
    widths[axis] = (0, pad)
    return jnp.pad(a, widths)


def _tpu_vmem_info():
    """(per-core VMEM capacity bytes, #TensorCores sharing the parallel axis)."""
    cap = 128 * _MiB
    try:
        cap = int(pltpu.get_tpu_info().vmem_capacity_bytes)
    except Exception:
        pass
    # 64 MiB parts (v7x) have two TensorCores per chip; 128 MiB parts (v5e/v6e) one.
    n_cores = 2 if cap <= 96 * _MiB else 1
    return cap, n_cores


def _vmem_estimate(bt, np_, fp, hp, op, adj_bytes):
    """Rough per-step VMEM footprint (double-buffered IO + live temporaries)."""
    adj_b = 2 * bt * np_ * np_ * adj_bytes                   # adj double-buffer
    x_b = 2 * bt * np_ * fp * 4                              # x double-buffer
    tmp_b = bt * np_ * (2 * fp + 3 * hp + 2 * op) * 4        # raw1/casts/x1/raw2/x2/out
    out_b = 2 * bt * np_ * op * 4                            # out double-buffer
    w_b = 2 * 4 * (2 * fp * hp + 3 * hp * op + op * op + hp + 2 * op)
    return adj_b + x_b + tmp_b + out_b + w_b


def _pick_batch_tile(B, np_, fp, hp, op, adj_bytes, budget_bytes, n_cores):
    """Largest divisor of B fitting the VMEM budget.  On multi-TensorCore parts
    keep at least `n_cores` grid steps so the parallel axis feeds every core."""
    bt = B
    while bt > 1 and _vmem_estimate(bt, np_, fp, hp, op, adj_bytes) > budget_bytes:
        bt -= 1
    if n_cores >= 2 and B >= n_cores:
        bt = max(1, min(bt, B // n_cores))
    while B % bt:
        bt -= 1
    return max(bt, 1)


# --------------------------------------------------------------------------- #
# Public forward
# --------------------------------------------------------------------------- #
def block_forward(x, adj, params, *, exact_bf16_adj=True):
    """x: (B, N, F_in) f32, adj: (B, N, N) f32 -> (B, N, F_out) f32.

    exact_bf16_adj: set False for weighted adjacencies whose values are not
    exactly representable in bfloat16 (keeps adj / aggregation in f32).
    """
    B, N, F_in = x.shape
    H = params["w1_rel"].shape[0]
    O = params["w2_rel"].shape[0]

    # ---- padding (zero padding is numerically exact) ----
    # Feature dims -> multiples of 128 lanes, with a guaranteed spare input
    # lane for the all-ones "degree" column.
    Fp = _round_up(F_in + 1, _LANE)
    Hp = _round_up(H, _LANE)
    Op = _round_up(O, _LANE)
    # Node dim: at least a multiple of 16 (bf16 sublane tile for adj); promote
    # to a multiple of 128 when that costs < 2x (lane-dense adj, MXU-aligned K).
    Np128 = _round_up(N, _LANE)
    Np = Np128 if Np128 <= 2 * N else _round_up(N, 16)

    agg_dtype = jnp.bfloat16 if exact_bf16_adj else jnp.float32
    adj_bytes = 2 if exact_bf16_adj else 4

    x_p = _pad_axis(_pad_axis(x.astype(jnp.float32), 1, Np), 2, Fp)
    x_p = x_p.at[:, :, F_in].set(1.0)          # degree column (see kernel)
    adj_p = _pad_axis(_pad_axis(adj, 1, Np), 2, Np).astype(agg_dtype)

    # Pre-transpose (+ pad) weights once in the wrapper: stored (in, out).
    as_row = lambda b: jnp.asarray(b, jnp.float32).reshape(1, -1)
    w1_rel = _pad_axis(_pad_axis(params["w1_rel"].T, 0, Fp), 1, Hp)
    w1_root = _pad_axis(_pad_axis(params["w1_root"].T, 0, Fp), 1, Hp)
    b1 = _pad_axis(as_row(params["b1"]), 1, Hp)
    w2_rel = _pad_axis(_pad_axis(params["w2_rel"].T, 0, Hp), 1, Op)
    w2_root = _pad_axis(_pad_axis(params["w2_root"].T, 0, Hp), 1, Op)
    b2 = _pad_axis(as_row(params["b2"]), 1, Op)
    wl1 = _pad_axis(_pad_axis(params["wl1"].T, 0, Hp), 1, Op)
    wl2 = _pad_axis(_pad_axis(params["wl2"].T, 0, Op), 1, Op)
    bl = _pad_axis(as_row(params["bl"]), 1, Op)

    # ---- generation-aware batch tiling / VMEM budget ----
    vmem_cap, n_cores = _tpu_vmem_info()
    if n_cores >= 2:                       # v7x: 64 MiB/TC, leave headroom
        budget = min(int(0.40 * vmem_cap), 26 * _MiB)
        limit_cap = int(0.82 * vmem_cap)
    else:                                  # v5e/v6e: 128 MiB, single TensorCore
        budget = int(0.70 * vmem_cap)
        limit_cap = int(0.86 * vmem_cap)

    Bt = _pick_batch_tile(B, Np, Fp, Hp, Op, adj_bytes, budget, n_cores)
    grid = (B // Bt,)

    need = _vmem_estimate(Bt, Np, Fp, Hp, Op, adj_bytes)
    vmem_limit = int(min(max(2 * need, 8 * _MiB), limit_cap))

    kernel = functools.partial(_block_kernel, ones_col=F_in, agg_dtype=agg_dtype)
    args = (x_p, adj_p, w1_rel, w1_root, b1, w2_rel, w2_root, b2, wl1, wl2, bl)

    def _run(single_buffer_weights):
        def _const(shape):
            kwargs = {}
            if single_buffer_weights:
                # Constant block index across the grid -> one VMEM copy suffices.
                kwargs["pipeline_mode"] = pl.Buffered(1)
            return pl.BlockSpec(shape, lambda b: tuple(0 for _ in shape), **kwargs)

        grid_spec = pltpu.PrefetchScalarGridSpec(
            num_scalar_prefetch=0,
            grid=grid,
            in_specs=[
                pl.BlockSpec((Bt, Np, Fp), lambda b: (b, 0, 0)),   # x
                pl.BlockSpec((Bt, Np, Np), lambda b: (b, 0, 0)),   # adj
                _const((Fp, Hp)),   # conv1.lin_rel.weight^T
                _const((Fp, Hp)),   # conv1.lin_root.weight^T
                _const((1, Hp)),    # conv1.lin_root.bias
                _const((Hp, Op)),   # conv2.lin_rel.weight^T
                _const((Hp, Op)),   # conv2.lin_root.weight^T
                _const((1, Op)),    # conv2.lin_root.bias
                _const((Hp, Op)),   # lin.weight[:, :H]^T
                _const((Op, Op)),   # lin.weight[:, H:]^T
                _const((1, Op)),    # lin.bias
            ],
            out_specs=pl.BlockSpec((Bt, Np, Op), lambda b: (b, 0, 0)),
        )
        return pl.pallas_call(
            kernel,
            out_shape=jax.ShapeDtypeStruct((B, Np, Op), jnp.float32),
            grid_spec=grid_spec,
            compiler_params=pltpu.CompilerParams(
                dimension_semantics=("parallel",),
                vmem_limit_bytes=vmem_limit),
        )(*args)

    try:
        out_p = _run(True)
    except Exception:
        # pipeline_mode=pl.Buffered(1) not supported on this jax build; fall
        # back to default double-buffered weight specs (correctness identical).
        out_p = _run(False)

    return out_p[:, :N, :O]


# --------------------------------------------------------------------------- #
# Pure-JAX reference + params
# --------------------------------------------------------------------------- #
def block_forward_ref(x, adj, params):
    """Pure-JAX reference mirroring the PyTorch forward (torch weight layout)."""
    deg = jnp.maximum(jnp.sum(adj, axis=-1, keepdims=True), 1.0)

    agg1 = jnp.einsum("bij,bjf->bif", adj, x) / deg
    x1 = jax.nn.relu(agg1 @ params["w1_rel"].T
                     + x @ params["w1_root"].T + params["b1"])
    agg2 = jnp.einsum("bij,bjf->bif", adj, x1) / deg
    x2 = jax.nn.relu(agg2 @ params["w2_rel"].T
                     + x1 @ params["w2_root"].T + params["b2"])
    cat = jnp.concatenate([x1, x2], axis=-1)
    w_lin = jnp.concatenate([params["wl1"], params["wl2"]], axis=-1)
    return cat @ w_lin.T + params["bl"]


def init_params(key, f_in, hidden, f_out):
    ks = jax.random.split(key, 7)
    s = lambda fan_in: 1.0 / jnp.sqrt(float(fan_in))
    return {
        "w1_rel":  jax.random.uniform(ks[0], (hidden, f_in), jnp.float32, -s(f_in), s(f_in)),
        "w1_root": jax.random.uniform(ks[1], (hidden, f_in), jnp.float32, -s(f_in), s(f_in)),
        "b1":      jnp.zeros((1, hidden), jnp.float32),
        "w2_rel":  jax.random.uniform(ks[2], (f_out, hidden), jnp.float32, -s(hidden), s(hidden)),
        "w2_root": jax.random.uniform(ks[3], (f_out, hidden), jnp.float32, -s(hidden), s(hidden)),
        "b2":      jnp.zeros((1, f_out), jnp.float32),
        # final Linear(hidden + f_out, f_out): weight split into x1-part and x2-part
        "wl1":     jax.random.uniform(ks[4], (f_out, hidden), jnp.float32,
                                      -s(hidden + f_out), s(hidden + f_out)),
        "wl2":     jax.random.uniform(ks[5], (f_out, f_out), jnp.float32,
                                      -s(hidden + f_out), s(hidden + f_out)),
        "bl":      jax.random.uniform(ks[6], (1, f_out), jnp.float32,
                                      -s(hidden + f_out), s(hidden + f_out)),
    }


if __name__ == "__main__":
    B, N = 2, 16
    F_IN, HIDDEN, F_OUT = 8, 32, 16

    key = jax.random.PRNGKey(0)
    k_x, k_adj, k_p = jax.random.split(key, 3)

    x = jax.random.normal(k_x, (B, N, F_IN), dtype=jnp.float32)
    # symmetric dense adjacency with self loops, {0,1}-valued (exact in bf16)
    a = (jax.random.uniform(k_adj, (B, N, N)) < 0.3).astype(jnp.float32)
    adj = jnp.clip(a + jnp.transpose(a, (0, 2, 1)) + jnp.eye(N)[None], 0.0, 1.0)

    params = init_params(k_p, F_IN, HIDDEN, F_OUT)

    out = block_forward(x, adj, params)
    jax.block_until_ready(out)

    ref = block_forward_ref(x, adj, params)
    assert out.shape == (B, N, F_OUT)
    err = float(jnp.max(jnp.abs(out - ref)))
    scale = float(jnp.max(jnp.abs(ref))) + 1e-6
    # bf16 aggregation + approx-reciprocal path -> relaxed (but tight) tolerance
    assert err <= 5e-2 * scale, (err, scale)

    print("KERNEL_OK")
</pallas_src>

<mosaic_0001>
module attributes {stable_mosaic.version = 11 : i64} {
  func.func @_block_kernel(%arg0: i32, %arg1: memref<2x16x128xf32, #tpu.memory_space<vmem>>, %arg2: memref<2x16x16xbf16, #tpu.memory_space<vmem>>, %arg3: memref<128x128xf32, #tpu.memory_space<vmem>>, %arg4: memref<128x128xf32, #tpu.memory_space<vmem>>, %arg5: memref<1x128xf32, #tpu.memory_space<vmem>>, %arg6: memref<128x128xf32, #tpu.memory_space<vmem>>, %arg7: memref<128x128xf32, #tpu.memory_space<vmem>>, %arg8: memref<1x128xf32, #tpu.memory_space<vmem>>, %arg9: memref<128x128xf32, #tpu.memory_space<vmem>>, %arg10: memref<128x128xf32, #tpu.memory_space<vmem>>, %arg11: memref<1x128xf32, #tpu.memory_space<vmem>>, %arg12: memref<2x16x128xf32, #tpu.memory_space<vmem>>) attributes {dimension_semantics = [#tpu.dimension_semantics<parallel>], iteration_bounds = array<i64: 1>, scalar_prefetch = 0 : i64, scratch_operands = 0 : i64, tpu.core_type = #tpu.core_type<tc>, window_params = [{transform_indices = @transform_0, window_bounds = array<i64: 2, 16, 128>}, {transform_indices = @transform_1, window_bounds = array<i64: 2, 16, 16>}, {pipeline_mode = #tpu.pipeline_mode<synchronous>, transform_indices = @transform_2, window_bounds = array<i64: 128, 128>}, {pipeline_mode = #tpu.pipeline_mode<synchronous>, transform_indices = @transform_3, window_bounds = array<i64: 128, 128>}, {pipeline_mode = #tpu.pipeline_mode<synchronous>, transform_indices = @transform_4, window_bounds = array<i64: 1, 128>}, {pipeline_mode = #tpu.pipeline_mode<synchronous>, transform_indices = @transform_5, window_bounds = array<i64: 128, 128>}, {pipeline_mode = #tpu.pipeline_mode<synchronous>, transform_indices = @transform_6, window_bounds = array<i64: 128, 128>}, {pipeline_mode = #tpu.pipeline_mode<synchronous>, transform_indices = @transform_7, window_bounds = array<i64: 1, 128>}, {pipeline_mode = #tpu.pipeline_mode<synchronous>, transform_indices = @transform_8, window_bounds = array<i64: 128, 128>}, {pipeline_mode = #tpu.pipeline_mode<synchronous>, transform_indices = @transform_9, window_bounds = array<i64: 128, 128>}, {pipeline_mode = #tpu.pipeline_mode<synchronous>, transform_indices = @transform_10, window_bounds = array<i64: 1, 128>}, {transform_indices = @transform_11, window_bounds = array<i64: 2, 16, 128>}]} {
    %c0 = arith.constant 0 : index
    %c0_0 = arith.constant 0 : index
    %c0_1 = arith.constant 0 : index
    %0 = vector.load %arg1[%c0, %c0_0, %c0_1] : memref<2x16x128xf32, #tpu.memory_space<vmem>>, vector<2x16x128xf32>
    %c0_2 = arith.constant 0 : index
    %c0_3 = arith.constant 0 : index
    %c0_4 = arith.constant 0 : index
    %1 = vector.load %arg2[%c0_2, %c0_3, %c0_4] : memref<2x16x16xbf16, #tpu.memory_space<vmem>>, vector<2x16x16xbf16>
    %2 = arith.truncf %0 : vector<2x16x128xf32> to vector<2x16x128xbf16>
    "tpu.trace_start"() <{level = 10 : i32, message = "bij,bjf->bif"}> : () -> ()
    %cst = arith.constant dense<0.000000e+00> : vector<2x16x128xf32>
    %3 = tpu.matmul %1, %2, %cst {dimension_numbers = #tpu.dot_dimension_numbers<[2], [1], [1], [2], [0, 0, 0, 1, 1, 2], [0], [0]>} : vector<2x16x16xbf16>, vector<2x16x128xbf16>, vector<2x16x128xf32> -> vector<2x16x128xf32>
    "tpu.trace_stop"() : () -> ()
    %4 = vector.extract_strided_slice %3 {offsets = [0, 0, 8], sizes = [2, 16, 1], strides = [1, 1, 1]} : vector<2x16x128xf32> to vector<2x16x1xf32>
    %cst_5 = arith.constant 1.000000e+00 : f32
    %5 = vector.broadcast %cst_5 : f32 to vector<2x16x1xf32>
    %6 = arith.maximumf %4, %5 : vector<2x16x1xf32>
    %7 = tpu.reciprocal %6 {approx = true} : vector<2x16x1xf32> -> vector<2x16x1xf32>
    %8 = vector.shape_cast %0 : vector<2x16x128xf32> to vector<32x128xf32>
    %9 = vector.shape_cast %3 : vector<2x16x128xf32> to vector<32x128xf32>
    %10 = vector.shape_cast %7 : vector<2x16x1xf32> to vector<32x1xf32>
    %c0_6 = arith.constant 0 : index
    %c0_7 = arith.constant 0 : index
    %11 = vector.load %arg3[%c0_6, %c0_7] : memref<128x128xf32, #tpu.memory_space<vmem>>, vector<128x128xf32>
    %cst_8 = arith.constant dense<0.000000e+00> : vector<32x128xf32>
    %12 = tpu.matmul %9, %11, %cst_8 {dimension_numbers = #tpu.dot_dimension_numbers<[1], [0], [0], [1], [0, 0, 1, 1], [], []>} : vector<32x128xf32>, vector<128x128xf32>, vector<32x128xf32> -> vector<32x128xf32>
    %13 = vector.broadcast %10 : vector<32x1xf32> to vector<32x128xf32>
    %14 = arith.mulf %12, %13 : vector<32x128xf32>
    %c0_9 = arith.constant 0 : index
    %c0_10 = arith.constant 0 : index
    %15 = vector.load %arg4[%c0_9, %c0_10] : memref<128x128xf32, #tpu.memory_space<vmem>>, vector<128x128xf32>
    %cst_11 = arith.constant dense<0.000000e+00> : vector<32x128xf32>
    %16 = tpu.matmul %8, %15, %cst_11 {dimension_numbers = #tpu.dot_dimension_numbers<[1], [0], [0], [1], [0, 0, 1, 1], [], []>} : vector<32x128xf32>, vector<128x128xf32>, vector<32x128xf32> -> vector<32x128xf32>
    %17 = arith.addf %14, %16 : vector<32x128xf32>
    %c0_12 = arith.constant 0 : index
    %c0_13 = arith.constant 0 : index
    %18 = vector.load %arg5[%c0_12, %c0_13] : memref<1x128xf32, #tpu.memory_space<vmem>>, vector<1x128xf32>
    %19 = vector.broadcast %18 : vector<1x128xf32> to vector<32x128xf32>
    %20 = arith.addf %17, %19 : vector<32x128xf32>
    %cst_14 = arith.constant 0.000000e+00 : f32
    %21 = vector.broadcast %cst_14 : f32 to vector<32x128xf32>
    %22 = arith.maximumf %20, %21 : vector<32x128xf32>
    %23 = vector.shape_cast %22 : vector<32x128xf32> to vector<2x16x128xf32>
    %24 = arith.truncf %23 : vector<2x16x128xf32> to vector<2x16x128xbf16>
    "tpu.trace_start"() <{level = 10 : i32, message = "bij,bjh->bih"}> : () -> ()
    %cst_15 = arith.constant dense<0.000000e+00> : vector<2x16x128xf32>
    %25 = tpu.matmul %1, %24, %cst_15 {dimension_numbers = #tpu.dot_dimension_numbers<[2], [1], [1], [2], [0, 0, 0, 1, 1, 2], [0], [0]>} : vector<2x16x16xbf16>, vector<2x16x128xbf16>, vector<2x16x128xf32> -> vector<2x16x128xf32>
    "tpu.trace_stop"() : () -> ()
    %26 = vector.shape_cast %25 : vector<2x16x128xf32> to vector<32x128xf32>
    %c0_16 = arith.constant 0 : index
    %c0_17 = arith.constant 0 : index
    %27 = vector.load %arg6[%c0_16, %c0_17] : memref<128x128xf32, #tpu.memory_space<vmem>>, vector<128x128xf32>
    %cst_18 = arith.constant dense<0.000000e+00> : vector<32x128xf32>
    %28 = tpu.matmul %26, %27, %cst_18 {dimension_numbers = #tpu.dot_dimension_numbers<[1], [0], [0], [1], [0, 0, 1, 1], [], []>} : vector<32x128xf32>, vector<128x128xf32>, vector<32x128xf32> -> vector<32x128xf32>
    %29 = vector.broadcast %10 : vector<32x1xf32> to vector<32x128xf32>
    %30 = arith.mulf %28, %29 : vector<32x128xf32>
    %c0_19 = arith.constant 0 : index
    %c0_20 = arith.constant 0 : index
    %31 = vector.load %arg7[%c0_19, %c0_20] : memref<128x128xf32, #tpu.memory_space<vmem>>, vector<128x128xf32>
    %cst_21 = arith.constant dense<0.000000e+00> : vector<32x128xf32>
    %32 = tpu.matmul %22, %31, %cst_21 {dimension_numbers = #tpu.dot_dimension_numbers<[1], [0], [0], [1], [0, 0, 1, 1], [], []>} : vector<32x128xf32>, vector<128x128xf32>, vector<32x128xf32> -> vector<32x128xf32>
    %33 = arith.addf %30, %32 : vector<32x128xf32>
    %c0_22 = arith.constant 0 : index
    %c0_23 = arith.constant 0 : index
    %34 = vector.load %arg8[%c0_22, %c0_23] : memref<1x128xf32, #tpu.memory_space<vmem>>, vector<1x128xf32>
    %35 = vector.broadcast %34 : vector<1x128xf32> to vector<32x128xf32>
    %36 = arith.addf %33, %35 : vector<32x128xf32>
    %cst_24 = arith.constant 0.000000e+00 : f32
    %37 = vector.broadcast %cst_24 : f32 to vector<32x128xf32>
    %38 = arith.maximumf %36, %37 : vector<32x128xf32>
    %c0_25 = arith.constant 0 : index
    %c0_26 = arith.constant 0 : index
    %39 = vector.load %arg9[%c0_25, %c0_26] : memref<128x128xf32, #tpu.memory_space<vmem>>, vector<128x128xf32>
    %cst_27 = arith.constant dense<0.000000e+00> : vector<32x128xf32>
    %40 = tpu.matmul %22, %39, %cst_27 {dimension_numbers = #tpu.dot_dimension_numbers<[1], [0], [0], [1], [0, 0, 1, 1], [], []>} : vector<32x128xf32>, vector<128x128xf32>, vector<32x128xf32> -> vector<32x128xf32>
    %c0_28 = arith.constant 0 : index
    %c0_29 = arith.constant 0 : index
    %41 = vector.load %arg10[%c0_28, %c0_29] : memref<128x128xf32, #tpu.memory_space<vmem>>, vector<128x128xf32>
    %cst_30 = arith.constant dense<0.000000e+00> : vector<32x128xf32>
    %42 = tpu.matmul %38, %41, %cst_30 {dimension_numbers = #tpu.dot_dimension_numbers<[1], [0], [0], [1], [0, 0, 1, 1], [], []>} : vector<32x128xf32>, vector<128x128xf32>, vector<32x128xf32> -> vector<32x128xf32>
    %43 = arith.addf %40, %42 : vector<32x128xf32>
    %c0_31 = arith.constant 0 : index
    %c0_32 = arith.constant 0 : index
    %44 = vector.load %arg11[%c0_31, %c0_32] : memref<1x128xf32, #tpu.memory_space<vmem>>, vector<1x128xf32>
    %45 = vector.broadcast %44 : vector<1x128xf32> to vector<32x128xf32>
    %46 = arith.addf %43, %45 : vector<32x128xf32>
    %47 = vector.shape_cast %46 : vector<32x128xf32> to vector<2x16x128xf32>
    %c0_33 = arith.constant 0 : index
    %c0_34 = arith.constant 0 : index
    %c0_35 = arith.constant 0 : index
    %48 = vector.load %arg12[%c0_33, %c0_34, %c0_35] : memref<2x16x128xf32, #tpu.memory_space<vmem>>, vector<2x16x128xf32>
    tpu.vector_store %arg12[%c0_33, %c0_34, %c0_35], %47 {strides = array<i32>} : memref<2x16x128xf32, #tpu.memory_space<vmem>>, vector<2x16x128xf32>,
    return
  }
  func.func @transform_0(%arg0: i32) -> (i32, i32, i32) {
    %c0_i32 = arith.constant 0 : i32
    %c0_i32_0 = arith.constant 0 : i32
    %c0_i32_1 = arith.constant 0 : i32
    return %arg0, %c0_i32, %c0_i32_0 : i32, i32, i32
  }
  func.func @transform_1(%arg0: i32) -> (i32, i32, i32) {
    %c0_i32 = arith.constant 0 : i32
    %c0_i32_0 = arith.constant 0 : i32
    %c0_i32_1 = arith.constant 0 : i32
    return %arg0, %c0_i32, %c0_i32_0 : i32, i32, i32
  }
  func.func @transform_2(%arg0: i32) -> (i32, i32) {
    %c0_i32 = arith.constant 0 : i32
    %c0_i32_0 = arith.constant 0 : i32
    %c0_i32_1 = arith.constant 0 : i32
    return %c0_i32, %c0_i32_0 : i32, i32
  }
  func.func @transform_3(%arg0: i32) -> (i32, i32) {
    %c0_i32 = arith.constant 0 : i32
    %c0_i32_0 = arith.constant 0 : i32
    %c0_i32_1 = arith.constant 0 : i32
    return %c0_i32, %c0_i32_0 : i32, i32
  }
  func.func @transform_4(%arg0: i32) -> (i32, i32) {
    %c0_i32 = arith.constant 0 : i32
    %c0_i32_0 = arith.constant 0 : i32
    %c0_i32_1 = arith.constant 0 : i32
    return %c0_i32, %c0_i32_0 : i32, i32
  }
  func.func @transform_5(%arg0: i32) -> (i32, i32) {
    %c0_i32 = arith.constant 0 : i32
    %c0_i32_0 = arith.constant 0 : i32
    %c0_i32_1 = arith.constant 0 : i32
    return %c0_i32, %c0_i32_0 : i32, i32
  }
  func.func @transform_6(%arg0: i32) -> (i32, i32) {
    %c0_i32 = arith.constant 0 : i32
    %c0_i32_0 = arith.constant 0 : i32
    %c0_i32_1 = arith.constant 0 : i32
    return %c0_i32, %c0_i32_0 : i32, i32
  }
  func.func @transform_7(%arg0: i32) -> (i32, i32) {
    %c0_i32 = arith.constant 0 : i32
    %c0_i32_0 = arith.constant 0 : i32
    %c0_i32_1 = arith.constant 0 : i32
    return %c0_i32, %c0_i32_0 : i32, i32
  }
  func.func @transform_8(%arg0: i32) -> (i32, i32) {
    %c0_i32 = arith.constant 0 : i32
    %c0_i32_0 = arith.constant 0 : i32
    %c0_i32_1 = arith.constant 0 : i32
    return %c0_i32, %c0_i32_0 : i32, i32
  }
  func.func @transform_9(%arg0: i32) -> (i32, i32) {
    %c0_i32 = arith.constant 0 : i32
    %c0_i32_0 = arith.constant 0 : i32
    %c0_i32_1 = arith.constant 0 : i32
    return %c0_i32, %c0_i32_0 : i32, i32
  }
  func.func @transform_10(%arg0: i32) -> (i32, i32) {
    %c0_i32 = arith.constant 0 : i32
    %c0_i32_0 = arith.constant 0 : i32
    %c0_i32_1 = arith.constant 0 : i32
    return %c0_i32, %c0_i32_0 : i32, i32
  }
  func.func @transform_11(%arg0: i32) -> (i32, i32, i32) {
    %c0_i32 = arith.constant 0 : i32
    %c0_i32_0 = arith.constant 0 : i32
    %c0_i32_1 = arith.constant 0 : i32
    return %arg0, %c0_i32, %c0_i32_0 : i32, i32, i32
  }
}

module attributes {stable_mosaic.version = 11 : i64} {
  func.func @_block_kernel(%arg0: i32, %arg1: memref<2x16x128xf32, #tpu.memory_space<vmem>>, %arg2: memref<2x16x16xbf16, #tpu.memory_space<vmem>>, %arg3: memref<128x128xf32, #tpu.memory_space<vmem>>, %arg4: memref<128x128xf32, #tpu.memory_space<vmem>>, %arg5: memref<1x128xf32, #tpu.memory_space<vmem>>, %arg6: memref<128x128xf32, #tpu.memory_space<vmem>>, %arg7: memref<128x128xf32, #tpu.memory_space<vmem>>, %arg8: memref<1x128xf32, #tpu.memory_space<vmem>>, %arg9: memref<128x128xf32, #tpu.memory_space<vmem>>, %arg10: memref<128x128xf32, #tpu.memory_space<vmem>>, %arg11: memref<1x128xf32, #tpu.memory_space<vmem>>, %arg12: memref<2x16x128xf32, #tpu.memory_space<vmem>>) attributes {dimension_semantics = [#tpu.dimension_semantics<parallel>], iteration_bounds = array<i64: 1>, scalar_prefetch = 0 : i64, scratch_operands = 0 : i64, tpu.core_type = #tpu.core_type<tc>, window_params = [{transform_indices = @transform_0, window_bounds = array<i64: 2, 16, 128>}, {transform_indices = @transform_1, window_bounds = array<i64: 2, 16, 16>}, {pipeline_mode = #tpu.pipeline_mode<synchronous>, transform_indices = @transform_2, window_bounds = array<i64: 128, 128>}, {pipeline_mode = #tpu.pipeline_mode<synchronous>, transform_indices = @transform_3, window_bounds = array<i64: 128, 128>}, {pipeline_mode = #tpu.pipeline_mode<synchronous>, transform_indices = @transform_4, window_bounds = array<i64: 1, 128>}, {pipeline_mode = #tpu.pipeline_mode<synchronous>, transform_indices = @transform_5, window_bounds = array<i64: 128, 128>}, {pipeline_mode = #tpu.pipeline_mode<synchronous>, transform_indices = @transform_6, window_bounds = array<i64: 128, 128>}, {pipeline_mode = #tpu.pipeline_mode<synchronous>, transform_indices = @transform_7, window_bounds = array<i64: 1, 128>}, {pipeline_mode = #tpu.pipeline_mode<synchronous>, transform_indices = @transform_8, window_bounds = array<i64: 128, 128>}, {pipeline_mode = #tpu.pipeline_mode<synchronous>, transform_indices = @transform_9, window_bounds = array<i64: 128, 128>}, {pipeline_mode = #tpu.pipeline_mode<synchronous>, transform_indices = @transform_10, window_bounds = array<i64: 1, 128>}, {transform_indices = @transform_11, window_bounds = array<i64: 2, 16, 128>}]} {
    %c0 = arith.constant 0 : index
    %c0_0 = arith.constant 0 : index
    %c0_1 = arith.constant 0 : index
    %0 = vector.load %arg1[%c0, %c0_0, %c0_1] : memref<2x16x128xf32, #tpu.memory_space<vmem>>, vector<2x16x128xf32>
    %c0_2 = arith.constant 0 : index
    %c0_3 = arith.constant 0 : index
    %c0_4 = arith.constant 0 : index
    %1 = vector.load %arg2[%c0_2, %c0_3, %c0_4] : memref<2x16x16xbf16, #tpu.memory_space<vmem>>, vector<2x16x16xbf16>
    %2 = arith.truncf %0 : vector<2x16x128xf32> to vector<2x16x128xbf16>
    "tpu.trace_start"() <{level = 10 : i32, message = "bij,bjf->bif"}> : () -> ()
    %cst = arith.constant dense<0.000000e+00> : vector<2x16x128xf32>
    %3 = tpu.matmul %1, %2, %cst {dimension_numbers = #tpu.dot_dimension_numbers<[2], [1], [1], [2], [0, 0, 0, 1, 1, 2], [0], [0]>} : vector<2x16x16xbf16>, vector<2x16x128xbf16>, vector<2x16x128xf32> -> vector<2x16x128xf32>
    "tpu.trace_stop"() : () -> ()
    %4 = vector.extract_strided_slice %3 {offsets = [0, 0, 8], sizes = [2, 16, 1], strides = [1, 1, 1]} : vector<2x16x128xf32> to vector<2x16x1xf32>
    %cst_5 = arith.constant 1.000000e+00 : f32
    %5 = vector.broadcast %cst_5 : f32 to vector<2x16x1xf32>
    %6 = arith.maximumf %4, %5 : vector<2x16x1xf32>
    %7 = tpu.reciprocal %6 {approx = true} : vector<2x16x1xf32> -> vector<2x16x1xf32>
    %8 = vector.shape_cast %0 : vector<2x16x128xf32> to vector<32x128xf32>
    %9 = vector.shape_cast %3 : vector<2x16x128xf32> to vector<32x128xf32>
    %10 = vector.shape_cast %7 : vector<2x16x1xf32> to vector<32x1xf32>
    %c0_6 = arith.constant 0 : index
    %c0_7 = arith.constant 0 : index
    %11 = vector.load %arg3[%c0_6, %c0_7] : memref<128x128xf32, #tpu.memory_space<vmem>>, vector<128x128xf32>
    %cst_8 = arith.constant dense<0.000000e+00> : vector<32x128xf32>
    %12 = tpu.matmul %9, %11, %cst_8 {dimension_numbers = #tpu.dot_dimension_numbers<[1], [0], [0], [1], [0, 0, 1, 1], [], []>} : vector<32x128xf32>, vector<128x128xf32>, vector<32x128xf32> -> vector<32x128xf32>
    %13 = vector.broadcast %10 : vector<32x1xf32> to vector<32x128xf32>
    %14 = arith.mulf %12, %13 : vector<32x128xf32>
    %c0_9 = arith.constant 0 : index
    %c0_10 = arith.constant 0 : index
    %15 = vector.load %arg4[%c0_9, %c0_10] : memref<128x128xf32, #tpu.memory_space<vmem>>, vector<128x128xf32>
    %cst_11 = arith.constant dense<0.000000e+00> : vector<32x128xf32>
    %16 = tpu.matmul %8, %15, %cst_11 {dimension_numbers = #tpu.dot_dimension_numbers<[1], [0], [0], [1], [0, 0, 1, 1], [], []>} : vector<32x128xf32>, vector<128x128xf32>, vector<32x128xf32> -> vector<32x128xf32>
    %17 = arith.addf %14, %16 : vector<32x128xf32>
    %c0_12 = arith.constant 0 : index
    %c0_13 = arith.constant 0 : index
    %18 = vector.load %arg5[%c0_12, %c0_13] : memref<1x128xf32, #tpu.memory_space<vmem>>, vector<1x128xf32>
    %19 = vector.broadcast %18 : vector<1x128xf32> to vector<32x128xf32>
    %20 = arith.addf %17, %19 : vector<32x128xf32>
    %cst_14 = arith.constant 0.000000e+00 : f32
    %21 = vector.broadcast %cst_14 : f32 to vector<32x128xf32>
    %22 = arith.maximumf %20, %21 : vector<32x128xf32>
    %23 = vector.shape_cast %22 : vector<32x128xf32> to vector<2x16x128xf32>
    %24 = arith.truncf %23 : vector<2x16x128xf32> to vector<2x16x128xbf16>
    "tpu.trace_start"() <{level = 10 : i32, message = "bij,bjh->bih"}> : () -> ()
    %cst_15 = arith.constant dense<0.000000e+00> : vector<2x16x128xf32>
    %25 = tpu.matmul %1, %24, %cst_15 {dimension_numbers = #tpu.dot_dimension_numbers<[2], [1], [1], [2], [0, 0, 0, 1, 1, 2], [0], [0]>} : vector<2x16x16xbf16>, vector<2x16x128xbf16>, vector<2x16x128xf32> -> vector<2x16x128xf32>
    "tpu.trace_stop"() : () -> ()
    %26 = vector.shape_cast %25 : vector<2x16x128xf32> to vector<32x128xf32>
    %c0_16 = arith.constant 0 : index
    %c0_17 = arith.constant 0 : index
    %27 = vector.load %arg6[%c0_16, %c0_17] : memref<128x128xf32, #tpu.memory_space<vmem>>, vector<128x128xf32>
    %cst_18 = arith.constant dense<0.000000e+00> : vector<32x128xf32>
    %28 = tpu.matmul %26, %27, %cst_18 {dimension_numbers = #tpu.dot_dimension_numbers<[1], [0], [0], [1], [0, 0, 1, 1], [], []>} : vector<32x128xf32>, vector<128x128xf32>, vector<32x128xf32> -> vector<32x128xf32>
    %29 = vector.broadcast %10 : vector<32x1xf32> to vector<32x128xf32>
    %30 = arith.mulf %28, %29 : vector<32x128xf32>
    %c0_19 = arith.constant 0 : index
    %c0_20 = arith.constant 0 : index
    %31 = vector.load %arg7[%c0_19, %c0_20] : memref<128x128xf32, #tpu.memory_space<vmem>>, vector<128x128xf32>
    %cst_21 = arith.constant dense<0.000000e+00> : vector<32x128xf32>
    %32 = tpu.matmul %22, %31, %cst_21 {dimension_numbers = #tpu.dot_dimension_numbers<[1], [0], [0], [1], [0, 0, 1, 1], [], []>} : vector<32x128xf32>, vector<128x128xf32>, vector<32x128xf32> -> vector<32x128xf32>
    %33 = arith.addf %30, %32 : vector<32x128xf32>
    %c0_22 = arith.constant 0 : index
    %c0_23 = arith.constant 0 : index
    %34 = vector.load %arg8[%c0_22, %c0_23] : memref<1x128xf32, #tpu.memory_space<vmem>>, vector<1x128xf32>
    %35 = vector.broadcast %34 : vector<1x128xf32> to vector<32x128xf32>
    %36 = arith.addf %33, %35 : vector<32x128xf32>
    %cst_24 = arith.constant 0.000000e+00 : f32
    %37 = vector.broadcast %cst_24 : f32 to vector<32x128xf32>
    %38 = arith.maximumf %36, %37 : vector<32x128xf32>
    %c0_25 = arith.constant 0 : index
    %c0_26 = arith.constant 0 : index
    %39 = vector.load %arg9[%c0_25, %c0_26] : memref<128x128xf32, #tpu.memory_space<vmem>>, vector<128x128xf32>
    %cst_27 = arith.constant dense<0.000000e+00> : vector<32x128xf32>
    %40 = tpu.matmul %22, %39, %cst_27 {dimension_numbers = #tpu.dot_dimension_numbers<[1], [0], [0], [1], [0, 0, 1, 1], [], []>} : vector<32x128xf32>, vector<128x128xf32>, vector<32x128xf32> -> vector<32x128xf32>
    %c0_28 = arith.constant 0 : index
    %c0_29 = arith.constant 0 : index
    %41 = vector.load %arg10[%c0_28, %c0_29] : memref<128x128xf32, #tpu.memory_space<vmem>>, vector<128x128xf32>
    %cst_30 = arith.constant dense<0.000000e+00> : vector<32x128xf32>
    %42 = tpu.matmul %38, %41, %cst_30 {dimension_numbers = #tpu.dot_dimension_numbers<[1], [0], [0], [1], [0, 0, 1, 1], [], []>} : vector<32x128xf32>, vector<128x128xf32>, vector<32x128xf32> -> vector<32x128xf32>
    %43 = arith.addf %40, %42 : vector<32x128xf32>
    %c0_31 = arith.constant 0 : index
    %c0_32 = arith.constant 0 : index
    %44 = vector.load %arg11[%c0_31, %c0_32] : memref<1x128xf32, #tpu.memory_space<vmem>>, vector<1x128xf32>
    %45 = vector.broadcast %44 : vector<1x128xf32> to vector<32x128xf32>
    %46 = arith.addf %43, %45 : vector<32x128xf32>
    %47 = vector.shape_cast %46 : vector<32x128xf32> to vector<2x16x128xf32>
    %c0_33 = arith.constant 0 : index
    %c0_34 = arith.constant 0 : index
    %c0_35 = arith.constant 0 : index
    %48 = vector.load %arg12[%c0_33, %c0_34, %c0_35] : memref<2x16x128xf32, #tpu.memory_space<vmem>>, vector<2x16x128xf32>
    tpu.vector_store %arg12[%c0_33, %c0_34, %c0_35], %47 {strides = array<i32>} : memref<2x16x128xf32, #tpu.memory_space<vmem>>, vector<2x16x128xf32>,
    return
  }
  func.func @transform_0(%arg0: i32) -> (i32, i32, i32) {
    %c0_i32 = arith.constant 0 : i32
    %c0_i32_0 = arith.constant 0 : i32
    %c0_i32_1 = arith.constant 0 : i32
    return %arg0, %c0_i32, %c0_i32_0 : i32, i32, i32
  }
  func.func @transform_1(%arg0: i32) -> (i32, i32, i32) {
    %c0_i32 = arith.constant 0 : i32
    %c0_i32_0 = arith.constant 0 : i32
    %c0_i32_1 = arith.constant 0 : i32
    return %arg0, %c0_i32, %c0_i32_0 : i32, i32, i32
  }
  func.func @transform_2(%arg0: i32) -> (i32, i32) {
    %c0_i32 = arith.constant 0 : i32
    %c0_i32_0 = arith.constant 0 : i32
    %c0_i32_1 = arith.constant 0 : i32
    return %c0_i32, %c0_i32_0 : i32, i32
  }
  func.func @transform_3(%arg0: i32) -> (i32, i32) {
    %c0_i32 = arith.constant 0 : i32
    %c0_i32_0 = arith.constant 0 : i32
    %c0_i32_1 = arith.constant 0 : i32
    return %c0_i32, %c0_i32_0 : i32, i32
  }
  func.func @transform_4(%arg0: i32) -> (i32, i32) {
    %c0_i32 = arith.constant 0 : i32
    %c0_i32_0 = arith.constant 0 : i32
    %c0_i32_1 = arith.constant 0 : i32
    return %c0_i32, %c0_i32_0 : i32, i32
  }
  func.func @transform_5(%arg0: i32) -> (i32, i32) {
    %c0_i32 = arith.constant 0 : i32
    %c0_i32_0 = arith.constant 0 : i32
    %c0_i32_1 = arith.constant 0 : i32
    return %c0_i32, %c0_i32_0 : i32, i32
  }
  func.func @transform_6(%arg0: i32) -> (i32, i32) {
    %c0_i32 = arith.constant 0 : i32
    %c0_i32_0 = arith.constant 0 : i32
    %c0_i32_1 = arith.constant 0 : i32
    return %c0_i32, %c0_i32_0 : i32, i32
  }
  func.func @transform_7(%arg0: i32) -> (i32, i32) {
    %c0_i32 = arith.constant 0 : i32
    %c0_i32_0 = arith.constant 0 : i32
    %c0_i32_1 = arith.constant 0 : i32
    return %c0_i32, %c0_i32_0 : i32, i32
  }
  func.func @transform_8(%arg0: i32) -> (i32, i32) {
    %c0_i32 = arith.constant 0 : i32
    %c0_i32_0 = arith.constant 0 : i32
    %c0_i32_1 = arith.constant 0 : i32
    return %c0_i32, %c0_i32_0 : i32, i32
  }
  func.func @transform_9(%arg0: i32) -> (i32, i32) {
    %c0_i32 = arith.constant 0 : i32
    %c0_i32_0 = arith.constant 0 : i32
    %c0_i32_1 = arith.constant 0 : i32
    return %c0_i32, %c0_i32_0 : i32, i32
  }
  func.func @transform_10(%arg0: i32) -> (i32, i32) {
    %c0_i32 = arith.constant 0 : i32
    %c0_i32_0 = arith.constant 0 : i32
    %c0_i32_1 = arith.constant 0 : i32
    return %c0_i32, %c0_i32_0 : i32, i32
  }
  func.func @transform_11(%arg0: i32) -> (i32, i32, i32) {
    %c0_i32 = arith.constant 0 : i32
    %c0_i32_0 = arith.constant 0 : i32
    %c0_i32_1 = arith.constant 0 : i32
    return %arg0, %c0_i32, %c0_i32_0 : i32, i32, i32
  }
}

</mosaic_0001>

<bundles_post_ra>
// kernel: tpu_custom_call.1
= control target key start
LH: loop header
LB: loop body
LE: loop exit
PB: predicated region body
PF: predicated region fallthrough
CT: control target
= control target key end

     0   :  { %16 = vsyncpa [#allocation3], 0  ;;  %s2174_s0 = inlined_call_operand.hbm [shape: f32[2,16,128], index: 0, kind: input, shape index: {}]   ;;  %s2175_s1 = inlined_call_operand.hbm [shape: bf16[2,16,16], index: 1, kind: input, shape index: {}]   ;;  %s2176_s2 = inlined_call_operand.hbm [shape: f32[128,128], index: 2, kind: input, shape index: {}]   ;;  %s2177_s3 = inlined_call_operand.hbm [shape: f32[128,128], index: 3, kind: input, shape index: {}]   ;;  %s2178_s4 = inlined_call_operand.vmem [shape: f32[1,128], index: 4, kind: input, shape index: {}]   ;;  %s2179_s5 = inlined_call_operand.hbm [shape: f32[128,128], index: 5, kind: input, shape index: {}]   ;;  %s2180_s6 = inlined_call_operand.hbm [shape: f32[128,128], index: 6, kind: input, shape index: {}]   ;;  %s2181_s7 = inlined_call_operand.vmem [shape: f32[1,128], index: 7, kind: input, shape index: {}]   ;;  %s2182_s8 = inlined_call_operand.hbm [shape: f32[128,128], index: 8, kind: input, shape index: {}]   ;;  %s2183_s9 = inlined_call_operand.hbm [shape: f32[128,128], index: 9, kind: input, shape index: {}]   ;;  %s2184_s10 = inlined_call_operand.vmem [shape: f32[1,128], index: 10, kind: input, shape index: {}]   ;;  %s2185_s11 = inlined_call_operand.hbm [shape: f32[2,16,128], index: 11, kind: output, shape index: {}]  }
   0x1   :  { %17 = vsyncpa [#allocation6], 0 }
   0x2   :  { %18 = vsyncpa [#allocation9], 0 }
   0x3   :  { %19 = vsyncpa [#allocation12], 0 }
   0x4   :  { %20 = vsyncpa [#allocation15], 0 }
   0x5   :  { %21 = vsyncpa [#allocation4], 0  ;;  %s1881_s17 = smov [#allocation5]   ;;  %s1671_s21 = scalar_lea.hbm %s2175_s1, 256 }
   0x6   :  { %s39_s18 = sshll.u32 %s1881_s17, 4  ;;  %p1672_p0 = scmp.ne.s32.totalorder %s2175_s1, %s1671_s21  ;;  %s40_s18 = int_to_ptr.vmem [resolvable:$true] %s39_s18 }
   0x7   :  { %p1675_p1 = scmp.lt.u32.totalorder %s1671_s21, %s2175_s1 }
   0x9   :  { %p1677_p2 = pnand %p1675_p1, %p1672_p0 }
   0xb   :  { %1680 = shalt.err (!%p1677_p2)
}
   0xc   :  { %s1681_s26 = scalar_lea.vmem %s40_s18, 256  ;;  %p1686_p4 = scmp.lt.s32.totalorder %s40_s18, %s40_s18 }
   0xd   :  { %p1682_p3 = scmp.ne.s32.totalorder %s40_s18, %s1681_s26  ;;  %p1687_p5 = scmp.lt.s32.totalorder %s1681_s26, %s1681_s26 }
   0xf   :  { %p1688_p6 = por %p1687_p5, %p1686_p4 }
  0x11   :  { %p1689_p7 = pnand %p1688_p6, %p1682_p3 }
  0x13   :  { %1692 = shalt.err (!%p1689_p7)
}
  0x14   :  { %s1882_s27 = smov 64   ;;  %s1883_s28 = smov 4  }
  0x15   :  { %45 = dma.hbm_to_vmem [thread:$0]  %s2175_s1, 256, %s40_s18, [#allocation6], %s1882_s27, %s1882_s27, %s1883_s28  }
  0x16   :  { %s1884_s12 = smov [#allocation8]   ;;  %s1885_s14 = smov [#allocation11]  }
  0x17   :  { %s63_s13 = sshll.u32 %s1884_s12, 4  ;;  %s89_s15 = sshll.u32 %s1885_s14, 4  ;;  %s64_s13 = int_to_ptr.vmem [resolvable:$true] %s63_s13  ;;  %s90_s15 = int_to_ptr.vmem [resolvable:$true] %s89_s15 }
  0x18   :  { %s1693_s19 = scalar_lea.hbm %s2177_s3, 2048 }
  0x19   :  { %p1694_p8 = scmp.ne.s32.totalorder %s2177_s3, %s1693_s19  ;;  %p1697_p9 = scmp.lt.u32.totalorder %s1693_s19, %s2177_s3 }
  0x1b   :  { %p1699_p10 = pnand %p1697_p9, %p1694_p8 }
  0x1d   :  { %1702 = shalt.err (!%p1699_p10)
}
  0x1e   :  { %s1703_s1 = scalar_lea.vmem %s64_s13, 2048  ;;  %p1708_p12 = scmp.lt.s32.totalorder %s64_s13, %s64_s13 }
  0x1f   :  { %p1704_p11 = scmp.ne.s32.totalorder %s64_s13, %s1703_s1  ;;  %p1709_p13 = scmp.lt.s32.totalorder %s1703_s1, %s1703_s1 }
  0x21   :  { %p1710_p0 = por %p1709_p13, %p1708_p12 }
  0x23   :  { %p1711_p1 = pnand %p1710_p0, %p1704_p11 }
  0x25   :  { %1714 = shalt.err (!%p1711_p1)
}
  0x26   :  { %s1886_s18 = smov 128   ;;  %s1887_s24 = smov 8  }
  0x27   :  { %69 = dma.hbm_to_vmem [thread:$0]  %s2177_s3, 2048, %s64_s13, [#allocation9], %s1886_s18, %s1886_s18, %s1887_s24  }
  0x28   :  { %s1715_s29 = scalar_lea.hbm %s2180_s6, 2048 }
  0x29   :  { %p1716_p2 = scmp.ne.s32.totalorder %s2180_s6, %s1715_s29  ;;  %p1719_p3 = scmp.lt.u32.totalorder %s1715_s29, %s2180_s6 }
  0x2b   :  { %p1721_p4 = pnand %p1719_p3, %p1716_p2 }
  0x2d   :  { %1724 = shalt.err (!%p1721_p4)
}
  0x2e   :  { %s1725_s17 = scalar_lea.vmem %s90_s15, 2048  ;;  %p1730_p6 = scmp.lt.s32.totalorder %s90_s15, %s90_s15 }
  0x2f   :  { %p1726_p5 = scmp.ne.s32.totalorder %s90_s15, %s1725_s17  ;;  %p1731_p7 = scmp.lt.s32.totalorder %s1725_s17, %s1725_s17 }
  0x31   :  { %p1732_p8 = por %p1731_p7, %p1730_p6 }
  0x33   :  { %p1733_p9 = pnand %p1732_p8, %p1726_p5 }
  0x35   :  { %1736 = shalt.err (!%p1733_p9)
}
  0x36   :  { %95 = dma.hbm_to_vmem [thread:$0]  %s2180_s6, 2048, %s90_s15, [#allocation12], %s1886_s18, %s1886_s18, %s1887_s24  }
  0x37   :  { %s1888_s19 = smov [#allocation2]   ;;  %s1889_s21 = smov [#allocation7]  }
  0x38   :  { %s27_s20 = sshll.u32 %s1888_s19, 4  ;;  %s51_s22 = sshll.u32 %s1889_s21, 4  ;;  %s28_s20 = int_to_ptr.vmem [resolvable:$true] %s27_s20  ;;  %s52_s22 = int_to_ptr.vmem [resolvable:$true] %s51_s22 }
  0x39   :  { %s1737_s25 = scalar_lea.hbm %s2174_s0, 512 }
  0x3a   :  { %p1738_p10 = scmp.ne.s32.totalorder %s2174_s0, %s1737_s25  ;;  %p1741_p11 = scmp.lt.u32.totalorder %s1737_s25, %s2174_s0 }
  0x3c   :  { %p1743_p12 = pnand %p1741_p11, %p1738_p10 }
  0x3e   :  { %1746 = shalt.err (!%p1743_p12)
}
  0x3f   :  { %s1747_s6 = scalar_lea.vmem %s28_s20, 512  ;;  %p1752_p0 = scmp.lt.s32.totalorder %s28_s20, %s28_s20 }
  0x40   :  { %p1748_p13 = scmp.ne.s32.totalorder %s28_s20, %s1747_s6  ;;  %p1753_p1 = scmp.lt.s32.totalorder %s1747_s6, %s1747_s6 }
  0x42   :  { %p1754_p2 = por %p1753_p1, %p1752_p0 }
  0x44   :  { %p1755_p3 = pnand %p1754_p2, %p1748_p13 }
  0x46   :  { %1758 = shalt.err (!%p1755_p3)
}
  0x47   :  { %33 = dma.hbm_to_vmem [thread:$0]  %s2174_s0, 512, %s28_s20, [#allocation3], %s1886_s18, %s1886_s18, %s1887_s24  }
  0x48   :  { %s1759_s16 = scalar_lea.hbm %s2176_s2, 2048 }
  0x49   :  { %p1760_p4 = scmp.ne.s32.totalorder %s2176_s2, %s1759_s16  ;;  %p1763_p5 = scmp.lt.u32.totalorder %s1759_s16, %s2176_s2 }
  0x4b   :  { %p1765_p6 = pnand %p1763_p5, %p1760_p4 }
  0x4d   :  { %1768 = shalt.err (!%p1765_p6)
}
  0x4e   :  { %s1769_s21 = scalar_lea.vmem %s52_s22, 2048  ;;  %p1774_p8 = scmp.lt.s32.totalorder %s52_s22, %s52_s22 }
  0x4f   :  { %p1770_p7 = scmp.ne.s32.totalorder %s52_s22, %s1769_s21  ;;  %p1775_p9 = scmp.lt.s32.totalorder %s1769_s21, %s1769_s21 }
  0x51   :  { %p1776_p10 = por %p1775_p9, %p1774_p8 }
  0x53   :  { %p1777_p11 = pnand %p1776_p10, %p1770_p7 }
  0x55   :  { %1780 = shalt.err (!%p1777_p11)
}
  0x56   :  { %57 = dma.hbm_to_vmem [thread:$0]  %s2176_s2, 2048, %s52_s22, [#allocation6], %s1886_s18, %s1886_s18, %s1887_s24  }
  0x57   :  { %s1890_s23 = smov [#allocation10]   ;;  %s1891_s25 = smov [#allocation13]  }
  0x58   :  { %s77_s1 = sshll.u32 %s1890_s23, 4  ;;  %s103_s26 = sshll.u32 %s1891_s25, 4  ;;  %s78_s1 = int_to_ptr.vmem [resolvable:$true] %s77_s1  ;;  %s104_s26 = int_to_ptr.vmem [resolvable:$true] %s103_s26 }
  0x59   :  { %s1781_s29 = scalar_lea.hbm %s2179_s5, 2048 }
  0x5a   :  { %p1782_p12 = scmp.ne.s32.totalorder %s2179_s5, %s1781_s29  ;;  %p1785_p13 = scmp.lt.u32.totalorder %s1781_s29, %s2179_s5 }
  0x5c   :  { %p1787_p0 = pnand %p1785_p13, %p1782_p12 }
  0x5e   :  { %1790 = shalt.err (!%p1787_p0)
}
  0x5f   :  { %s1791_s2 = scalar_lea.vmem %s78_s1, 2048  ;;  %p1796_p2 = scmp.lt.s32.totalorder %s78_s1, %s78_s1 }
  0x60   :  { %p1792_p1 = scmp.ne.s32.totalorder %s78_s1, %s1791_s2  ;;  %p1797_p3 = scmp.lt.s32.totalorder %s1791_s2, %s1791_s2 }
  0x62   :  { %p1798_p4 = por %p1797_p3, %p1796_p2 }
  0x64   :  { %p1799_p5 = pnand %p1798_p4, %p1792_p1 }
  0x66   :  { %1802 = shalt.err (!%p1799_p5)
}
  0x67   :  { %83 = dma.hbm_to_vmem [thread:$0]  %s2179_s5, 2048, %s78_s1, [#allocation9], %s1886_s18, %s1886_s18, %s1887_s24  }
  0x68   :  { %s1803_s3 = scalar_lea.hbm %s2182_s8, 2048 }
  0x69   :  { %p1804_p6 = scmp.ne.s32.totalorder %s2182_s8, %s1803_s3  ;;  %p1807_p7 = scmp.lt.u32.totalorder %s1803_s3, %s2182_s8 }
  0x6b   :  { %p1809_p8 = pnand %p1807_p7, %p1804_p6 }
  0x6d   :  { %1812 = shalt.err (!%p1809_p8)
}
  0x6e   :  { %s1813_s20 = scalar_lea.vmem %s104_s26, 2048  ;;  %p1818_p10 = scmp.lt.s32.totalorder %s104_s26, %s104_s26 }
  0x6f   :  { %p1814_p9 = scmp.ne.s32.totalorder %s104_s26, %s1813_s20  ;;  %p1819_p11 = scmp.lt.s32.totalorder %s1813_s20, %s1813_s20 }
  0x71   :  { %p1820_p12 = por %p1819_p11, %p1818_p10 }
  0x73   :  { %p1821_p13 = pnand %p1820_p12, %p1814_p9 }
  0x75   :  { %1824 = shalt.err (!%p1821_p13)
}
  0x76   :  { %109 = dma.hbm_to_vmem [thread:$0]  %s2182_s8, 2048, %s104_s26, [#allocation12], %s1886_s18, %s1886_s18, %s1887_s24  }
  0x77   :  { %s1892_s1 = smov [#allocation14]   ;;  %s1825_s29 = scalar_lea.hbm %s2183_s9, 2048 }
  0x78   :  { %s115_s25 = sshll.u32 %s1892_s1, 4  ;;  %p1826_p0 = scmp.ne.s32.totalorder %s2183_s9, %s1825_s29  ;;  %s116_s25 = int_to_ptr.vmem [resolvable:$true] %s115_s25 }
  0x79   :  { %p1829_p1 = scmp.lt.u32.totalorder %s1825_s29, %s2183_s9 }
  0x7b   :  { %p1831_p2 = pnand %p1829_p1, %p1826_p0 }
  0x7d   :  { %1834 = shalt.err (!%p1831_p2)
}
  0x7e   :  { %s1835_s2 = scalar_lea.vmem %s116_s25, 2048  ;;  %p1840_p4 = scmp.lt.s32.totalorder %s116_s25, %s116_s25 }
  0x7f   :  { %p1836_p3 = scmp.ne.s32.totalorder %s116_s25, %s1835_s2  ;;  %p1841_p5 = scmp.lt.s32.totalorder %s1835_s2, %s1835_s2 }
  0x81   :  { %p1842_p6 = por %p1841_p5, %p1840_p4 }
  0x83   :  { %p1843_p7 = pnand %p1842_p6, %p1836_p3 }
  0x85   :  { %1846 = shalt.err (!%p1843_p7)
}
  0x86   :  { %121 = dma.hbm_to_vmem [thread:$0]  %s2183_s9, 2048, %s116_s25, [#allocation15], %s1886_s18, %s1886_s18, %s1887_s24  }
  0x87   :  { %1869 = dma.done.wait [#allocation3], 512  }
  0x88   :  { %1870 = vsyncadd [#allocation3], 4294966784 }
  0x89   :  { %1871 = dma.done.wait [#allocation6], 2304  }
  0x8a   :  { %1872 = vsyncadd [#allocation6], 4294964992 }
  0x8b   :  { %1873 = dma.done.wait [#allocation9], 4096  }
  0x8c   :  { %1874 = vsyncadd [#allocation9], 4294963200 }
  0x8d   :  { %1875 = dma.done.wait [#allocation12], 4096  }
  0x8e   :  { %1876 = vsyncadd [#allocation12], 4294963200 }
  0x8f   :  { %1877 = dma.done.wait [#allocation15], 2048  }
  0x90   :  { %1878 = vsyncadd [#allocation15], 4294965248  ;;  %v1893_v0 = vmov 0.0   ;;  %vm1894_vm0 = vmmov 0   ;;  %v2080_v1 = vld [vmem:[#allocation2] sm:$0xff]  ;;  %v2082_v2 = vld [vmem:[#allocation2 + $0x8] sm:$0xff] }
  0x91   :  { %1195 = vmatprep.subr.bf16.mxu0 %v1893_v0  ;;  %1197 = vmatprep.mubr.msk.bf16.mxu0 %vm1894_vm0, %v1893_v0  ;;  %v157_v3 = vpack.c.bf16 %v2082_v2, %v2080_v1  ;;  %v2086_v4 = vld [vmem:[#allocation5] sm:$0xff]   ;;  %v2088_v5 = vld [vmem:[#allocation2 + $0x10] sm:$0xff]  ;;  %v2090_v6 = vld [vmem:[#allocation2 + $0x18] sm:$0xff]  ;;  %vm164_vm1 = vcmask 130048   ;;  %v1895_v36 = vmov 8   ;;  %s1896_s17 = smov [#allocation16]  }
  0x92   :  { %1201 = vmatprep.subr.bf16.mxu1 %v1893_v0  ;;  %1203 = vmatprep.mubr.msk.bf16.mxu1 %vm1894_vm0, %v1893_v0  ;;  %v158_v7 = vpack.c.bf16 %v2090_v6, %v2088_v5  ;;  %v266_v8 = vld [vmem:[#allocation7] sm:$0xff]  ;;  %v267_v9 = vld [vmem:[#allocation7 + $0x8] sm:$0xff]  ;;  %v2094_v10 = vld [vmem:[#allocation5 + $0x8] sm:$0xff]   ;;  %s1042_s3 = sshll.u32 %s1896_s17, 4  ;;  %s1043_s3 = int_to_ptr.vmem [resolvable:$true] %s1042_s3 }
  0x93   :  { %1196 = vmatpush3.bf16.msra.mxu0 %v157_v3  ;;  %v1447_v11 = vpack.c.bf16 %v267_v9, %v266_v8  ;;  %v268_v12 = vld [vmem:[#allocation7 + $0x10] sm:$0xff]  ;;  %v269_v13 = vld [vmem:[#allocation7 + $0x18] sm:$0xff]  ;;  %v270_v15 = vld [vmem:[#allocation7 + $0x20] sm:$0xff]  ;;  %1659 = vset.pattern.permute.xlu0 %v1895_v36  ;;  %s1847_s13 = scalar_lea.vmem %s1043_s3, 512  ;;  %p1852_p9 = scmp.lt.s32.totalorder %s1043_s3, %s1043_s3 }
  0x94   :  { %1283 = vmatprep.subr.bf16.mxu0 %v1893_v0  ;;  %1202 = vmatpush3.bf16.msra.mxu1 %v158_v7  ;;  %v1451_v14 = vpack.c.bf16 %v269_v13, %v268_v12  ;;  %v271_v16 = vld [vmem:[#allocation7 + $0x28] sm:$0xff]  ;;  %v272_v18 = vld [vmem:[#allocation7 + $0x30] sm:$0xff]  ;;  %v273_v19 = vld [vmem:[#allocation7 + $0x38] sm:$0xff]  ;;  %p1848_p8 = scmp.ne.s32.totalorder %s1043_s3, %s1847_s13  ;;  %p1853_p10 = scmp.lt.s32.totalorder %s1847_s13, %s1847_s13 }
  0x95   :  { %1448 = vmatprep.subr.bf16.mxu1 %v1447_v11  ;;  %v1455_v17 = vpack.c.bf16 %v271_v16, %v270_v15  ;;  %v1459_v20 = vpack.c.bf16 %v273_v19, %v272_v18  ;;  %v274_v21 = vld [vmem:[#allocation7 + $0x40] sm:$0xff]  ;;  %v275_v22 = vld [vmem:[#allocation7 + $0x48] sm:$0xff]  ;;  %v276_v24 = vld [vmem:[#allocation7 + $0x50] sm:$0xff]  ;;  %1660 = vset.pattern.permute.xlu1 %v1895_v36 }
  0x96   :  { %1198 = vmatmul.mubr.msk.bf16.vlgmr.msra.gmra.mrb[0].mxu0 %vm164_vm1, %v2086_v4  ;;  %v1463_v23 = vpack.c.bf16 %v275_v22, %v274_v21  ;;  %v277_v25 = vld [vmem:[#allocation7 + $0x58] sm:$0xff]  ;;  %v278_v27 = vld [vmem:[#allocation7 + $0x60] sm:$0xff]  ;;  %v279_v28 = vld [vmem:[#allocation7 + $0x68] sm:$0xff]  ;;  %p1854_p11 = por %p1853_p10, %p1852_p9 }
  0x97   :  { %1285 = vmatprep.mubr.msk.bf16.mxu0 %vm1894_vm0, %v1893_v0  ;;  %1204 = vmatmul.mubr.msk.bf16.vlgmr.msra.gmra.mrb[0].mxu1 %vm164_vm1, %v2094_v10  ;;  %v1467_v26 = vpack.c.bf16 %v277_v25, %v276_v24  ;;  %v1471_v29 = vpack.c.bf16 %v279_v28, %v278_v27  ;;  %v280_v30 = vld [vmem:[#allocation7 + $0x70] sm:$0xff]  ;;  %v281_v31 = vld [vmem:[#allocation7 + $0x78] sm:$0xff]  ;;  %v391_v33 = vld [vmem:[#allocation8] sm:$0xff] }
  0x98   :  { %1450 = vmatpush3.bf16.msra.mxu1 %v1447_v11  ;;  %v1475_v32 = vpack.c.bf16 %v281_v31, %v280_v30  ;;  %v392_v34 = vld [vmem:[#allocation8 + $0x8] sm:$0xff]  ;;  %v393_v37 = vld [vmem:[#allocation8 + $0x10] sm:$0xff]  ;;  %v394_v38 = vld [vmem:[#allocation8 + $0x18] sm:$0xff]  ;;  %p1855_p12 = pnand %p1854_p11, %p1848_p8 }
  0x99   :  { %1452 = vmatprep.subr.bf16.mxu1 %v1451_v14  ;;  %v1479_v35 = vpack.c.bf16 %v392_v34, %v391_v33  ;;  %v1483_v42 = vpack.c.bf16 %v394_v38, %v393_v37  ;;  %v395_v45 = vld [vmem:[#allocation8 + $0x20] sm:$0xff]  ;;  %v396_v46 = vld [vmem:[#allocation8 + $0x28] sm:$0xff]  ;;  %v397_v55 = vld [vmem:[#allocation8 + $0x30] sm:$0xff] }
  0x9a   :  { %v1487_v53 = vpack.c.bf16 %v396_v46, %v395_v45  ;;  %v398_v56 = vld [vmem:[#allocation8 + $0x38] sm:$0xff]  ;;  %v399_v58 = vld [vmem:[#allocation8 + $0x40] sm:$0xff]  ;;  %v400_v59 = vld [vmem:[#allocation8 + $0x48] sm:$0xff] }
  0x9b   :  { %v1491_v57 = vpack.c.bf16 %v398_v56, %v397_v55  ;;  %v1495_v61 = vpack.c.bf16 %v400_v59, %v399_v58  ;;  %v401_v62 = vld [vmem:[#allocation8 + $0x50] sm:$0xff]  ;;  %v402_v63 = vld [vmem:[#allocation8 + $0x58] sm:$0xff]  ;;  %v404_v11 = vld [vmem:[#allocation8 + $0x68] sm:$0xff] }
  0x9c   :  { %1454 = vmatpush3.bf16.msra.mxu1 %v1451_v14  ;;  %v1499_v8 = vpack.c.bf16 %v402_v63, %v401_v62  ;;  %v405_v13 = vld [vmem:[#allocation8 + $0x70] sm:$0xff]  ;;  %v406_v14 = vld [vmem:[#allocation8 + $0x78] sm:$0xff]  ;;  %v596_v33 = vld [vmem:[#allocation10 + $0x8] sm:$0xff] }
  0x9d   :  { %1456 = vmatprep.subr.bf16.mxu1 %v1455_v17  ;;  %v1507_v15 = vpack.c.bf16 %v406_v14, %v405_v13  ;;  %v597_v45 = vld [vmem:[#allocation10 + $0x10] sm:$0xff]  ;;  %v598_v46 = vld [vmem:[#allocation10 + $0x18] sm:$0xff]  ;;  %v600_v55 = vld [vmem:[#allocation10 + $0x28] sm:$0xff] }
  0x9e   :  { %v705_v58 = vld [vmem:[#allocation11 + $0x28] sm:$0xff]  ;;  %v706_v62 = vld [vmem:[#allocation11 + $0x30] sm:$0xff]  ;;  %v707_v63 = vld [vmem:[#allocation11 + $0x38] sm:$0xff] }
  0x9f   :  { %v606_v13 = vld [vmem:[#allocation10 + $0x58] sm:$0xff] }
  0xa0   :  { %1458 = vmatpush3.bf16.msra.mxu1 %v1455_v17 }
  0xa1   :  { %1460 = vmatprep.subr.bf16.mxu1 %v1459_v20 }
  0xa4   :  { %1462 = vmatpush3.bf16.msra.mxu1 %v1459_v20 }
  0xa5   :  { %1464 = vmatprep.subr.bf16.mxu1 %v1463_v23 }
  0xa8   :  { %1466 = vmatpush3.bf16.msra.mxu1 %v1463_v23 }
  0xa9   :  { %1468 = vmatprep.subr.bf16.mxu1 %v1467_v26 }
  0xac   :  { %1470 = vmatpush3.bf16.msra.mxu1 %v1467_v26 }
  0xad   :  { %1472 = vmatprep.subr.bf16.mxu1 %v1471_v29 }
  0xb0   :  { %1474 = vmatpush3.bf16.msra.mxu1 %v1471_v29 }
  0xb1   :  { %1476 = vmatprep.subr.bf16.mxu1 %v1475_v32 }
  0xb4   :  { %1478 = vmatpush3.bf16.msra.mxu1 %v1475_v32  ;;  %v595_v32 = vld [vmem:[#allocation10] sm:$0xff] }
  0xb5   :  { %1480 = vmatprep.subr.bf16.mxu1 %v1479_v35 }
 0x169   :  { %v202_v39 = vpop.f32.mrb[0].mxu0 }
 0x16a   :  { %v258_v40 = vmax.f32 %v202_v39, 1.0  ;;  %v1199_v41 = vpop.f32.mrb[1].mxu0  ;;  %1239 = vmatprep.mubr.f32.mxu1 %v202_v39  ;;  %v251_v44 = vpop.f32.mrb[0].mxu1 }
 0x16b   :  { %v205_v43 = vpop.f32.mrb[2].mxu0  ;;  %v260_v49 = vmax.f32 %v251_v44, 1.0  ;;  %v1205_v50 = vpop.f32.mrb[1].mxu1  ;;  %v1511_v41 = vpack.c.bf16 %v596_v33, %v595_v32  ;;  %v837_v32 = vld [vmem:[#allocation14 + $0x8] sm:$0xff] }
 0x16c   :  { %1663 = vrcp.f32 %v258_v40  ;;  %v259_v47 = vmax.f32 %v205_v43, 1.0  ;;  %v1200_v48 = vpop.f32.mrb[3].mxu0  ;;  %1240 = vmatmul.mubr.f32.vlgmr.msra.gmra.mrb[4].mxu1 %v205_v43  ;;  %v254_v51 = vpop.f32.mrb[2].mxu1  ;;  %v700_v40 = vld [vmem:[#allocation11] sm:$0xff]  ;;  %v1515_v50 = vpack.c.bf16 %v598_v46, %v597_v45 }
 0x16d   :  { %1482 = vmatpush3.bf16.msra.mxu1 %v1479_v35  ;;  %1242 = vmatprep.mubr.f32.mxu1 %v251_v44  ;;  %v261_v52 = vmax.f32 %v254_v51, 1.0  ;;  %v1206_v54 = vpop.f32.mrb[3].mxu1  ;;  %1665 = vrcp.f32 %v260_v49  ;;  %v701_v44 = vld [vmem:[#allocation11 + $0x8] sm:$0xff] }
 0x16e   :  { %1484 = vmatprep.subr.bf16.mxu1 %v1483_v42  ;;  %1667 = vrcp.f32 %v259_v47  ;;  %v1543_v49 = vpack.c.bf16 %v701_v44, %v700_v40  ;;  %v599_v54 = vld [vmem:[#allocation10 + $0x20] sm:$0xff] }
 0x16f   :  { %1669 = vrcp.f32 %v261_v52  ;;  %v702_v52 = vld [vmem:[#allocation11 + $0x10] sm:$0xff]  ;;  %v1519_v59 = vpack.c.bf16 %v600_v55, %v599_v54  ;;  %v844_v55 = vld [vmem:[#allocation14 + $0x40] sm:$0xff] }
 0x170   :  { %1243 = vmatmul.mubr.f32.gmra.mrb[6].mxu1 %v254_v51 }
 0x171   :  { %1486 = vmatpush3.bf16.msra.mxu1 %v1483_v42  ;;  %1277 = vmatprep.mubr.f32.mxu1 %v2080_v1  ;;  %v403_v1 = vld [vmem:[#allocation8 + $0x60] sm:$0xff] }
 0x172   :  { %1488 = vmatprep.subr.bf16.mxu1 %v1487_v53  ;;  %v1503_v12 = vpack.c.bf16 %v404_v11, %v403_v1  ;;  %v708_v1 = vld [vmem:[#allocation11 + $0x40] sm:$0xff] }
 0x175   :  { %1490 = vmatpush3.bf16.msra.mxu1 %v1487_v53  ;;  %v703_v53 = vld [vmem:[#allocation11 + $0x18] sm:$0xff] }
 0x176   :  { %v1664_v60 = vpop.eup %1663  ;;  %1492 = vmatprep.subr.bf16.mxu1 %v1491_v57  ;;  %v1547_v56 = vpack.c.bf16 %v703_v53, %v702_v52  ;;  %v843_v52 = vld [vmem:[#allocation14 + $0x38] sm:$0xff] }
 0x177   :  { %369 = vperm.xlu0 %1659, %v1664_v60   ;;  %v1666_v3 = vpop.eup %1665  ;;  %v601_v60 = vld [vmem:[#allocation10 + $0x30] sm:$0xff] }
 0x178   :  { %v1668_v7 = vpop.eup %1667  ;;  %379 = vperm.xlu1 %1660, %v1666_v3  }
 0x179   :  { %1494 = vmatpush3.bf16.msra.mxu1 %v1491_v57  ;;  %v1670_v9 = vpop.eup %1669  ;;  %v704_v57 = vld [vmem:[#allocation11 + $0x20] sm:$0xff] }
 0x17a   :  { %1496 = vmatprep.subr.bf16.mxu1 %v1495_v61 }
 0x17b   :  { %374 = vperm.xlu0 %1659, %v1668_v7   ;;  %v603_v7 = vld [vmem:[#allocation10 + $0x40] sm:$0xff] }
 0x17c   :  { %384 = vperm.xlu1 %1660, %v1670_v9   ;;  %v1555_v9 = vpack.c.bf16 %v707_v63, %v706_v62 }
 0x17d   :  { %1498 = vmatpush3.bf16.msra.mxu1 %v1495_v61  ;;  %v602_v61 = vld [vmem:[#allocation10 + $0x38] sm:$0xff] }
 0x17e   :  { %1500 = vmatprep.subr.bf16.mxu1 %v1499_v8  ;;  %v1523_v3 = vpack.c.bf16 %v602_v61, %v601_v60 }
 0x181   :  { %1502 = vmatpush3.bf16.msra.mxu1 %v1499_v8  ;;  %v604_v8 = vld [vmem:[#allocation10 + $0x48] sm:$0xff] }
 0x182   :  { %1504 = vmatprep.subr.bf16.mxu1 %v1503_v12  ;;  %v1527_v11 = vpack.c.bf16 %v604_v8, %v603_v7  ;;  %v849_v7 = vld [vmem:[#allocation14 + $0x68] sm:$0xff] }
 0x185   :  { %1506 = vmatpush3.bf16.msra.mxu1 %v1503_v12  ;;  %v605_v12 = vld [vmem:[#allocation10 + $0x50] sm:$0xff] }
 0x186   :  { %1508 = vmatprep.subr.bf16.mxu1 %v1507_v15 }
 0x189   :  { %1510 = vmatpush3.bf16.msra.mxu1 %v1507_v15  ;;  %v710_v15 = vld [vmem:[#allocation11 + $0x50] sm:$0xff] }
 0x18a   :  { %1289 = vmatprep.subr.bf16.mxu1 %v1893_v0 }
 0x18c   :  { %1278 = vmatmul.mubr.f32.vlgmr.msra.gmra.mrb[8].mxu1 %v2082_v2 }
 0x18d   :  { %1280 = vmatprep.mubr.f32.mxu1 %v2088_v5 }
 0x190   :  { %1281 = vmatmul.mubr.f32.gmra.mrb[10].mxu1 %v2090_v6  ;;  %v1062_v6 = vld [vmem:[%s2178_s4] ss:$0 sm:$0xff] }
 0x191   :  { %1291 = vmatprep.mubr.msk.bf16.mxu1 %vm1894_vm0, %v1893_v0 }
 0x1f6   :  { %v2110_v20 = vpop.permute.xlu0 %369 }
 0x1f7   :  { %v2112_v21 = vpop.permute.xlu1 %379 }
 0x1fa   :  { %v2114_v22 = vpop.permute.xlu0 %374 }
 0x1fb   :  { %v2121_v25 = vpop.permute.xlu1 %384 }
 0x23f   :  { %v1241_v16 = vpop.f32.mrb[4].mxu1 }
 0x240   :  { %v348_v17 = vpop.f32.mrb[5].mxu1  ;;  %v388_v23 = vmul.f32 %v1241_v16, %v2114_v22  ;;  %v711_v16 = vld [vmem:[#allocation11 + $0x58] sm:$0xff] }
 0x241   :  { %v387_v2 = vmul.f32 %v2110_v20, %v348_v17  ;;  %v1531_v17 = vpack.c.bf16 %v606_v13, %v605_v12  ;;  %v821_v12 = vld [vmem:[#allocation13 + $0x8] sm:$0xff] }
 0x243   :  { %v1244_v18 = vpop.f32.mrb[6].mxu1 }
 0x244   :  { %v358_v19 = vpop.f32.mrb[7].mxu1  ;;  %v390_v27 = vmul.f32 %v1244_v18, %v2121_v25  ;;  %v607_v18 = vld [vmem:[#allocation10 + $0x60] sm:$0xff] }
 0x245   :  { %v389_v29 = vmul.f32 %v2112_v21, %v358_v19  ;;  %v608_v19 = vld [vmem:[#allocation10 + $0x68] sm:$0xff] }
 0x25f   :  { %v1279_v5 = vpop.f32.mrb[8].mxu1 }
 0x260   :  { %v493_v0 = vadd.f32 %v1279_v5, %v388_v23  ;;  %v473_v24 = vpop.f32.mrb[9].mxu1  ;;  %v1563_v23 = vpack.c.bf16 %v711_v16, %v710_v15  ;;  %v713_v5 = vld [vmem:[#allocation11 + $0x68] sm:$0xff] }
 0x261   :  { %v492_v26 = vadd.f32 %v473_v24, %v387_v2  ;;  %v712_v2 = vld [vmem:[#allocation11 + $0x60] sm:$0xff]  ;;  %v610_v24 = vld [vmem:[#allocation10 + $0x78] sm:$0xff] }
 0x262   :  { %v504_v28 = vadd.f32 %v1062_v6, %v493_v0  ;;  %v609_v0 = vld [vmem:[#allocation10 + $0x70] sm:$0xff] }
 0x263   :  { %v503_v30 = vadd.f32 %v1062_v6, %v492_v26  ;;  %v1282_v31 = vpop.f32.mrb[10].mxu1  ;;  %v1567_v26 = vpack.c.bf16 %v713_v5, %v712_v2 }
 0x264   :  { %v2125_v34 = vmax.f32 %v504_v28, 0.0  ;;  %v495_v35 = vadd.f32 %v1282_v31, %v390_v27  ;;  %v483_v36 = vpop.f32.mrb[11].mxu1  ;;  %v714_v27 = vld [vmem:[#allocation11 + $0x70] sm:$0xff]  ;;  %v715_v28 = vld [vmem:[#allocation11 + $0x78] sm:$0xff]  ;;  %v836_v31 = vld [vmem:[#allocation14] sm:$0xff] }
 0x265   :  { %v2127_v37 = vmax.f32 %v503_v30, 0.0  ;;  %v494_v38 = vadd.f32 %v483_v36, %v389_v29  ;;  %v1539_v29 = vpack.c.bf16 %v610_v24, %v609_v0  ;;  %v1571_v30 = vpack.c.bf16 %v715_v28, %v714_v27  ;;  %v839_v36 = vld [vmem:[#allocation14 + $0x18] sm:$0xff]  ;;  %v822_v27 = vld [vmem:[#allocation13 + $0x10] sm:$0xff] }
 0x266   :  { %v506_v39 = vadd.f32 %v1062_v6, %v495_v35  ;;  %v1575_v33 = vpack.c.bf16 %v837_v32, %v836_v31  ;;  %v838_v35 = vld [vmem:[#allocation14 + $0x10] sm:$0xff]  ;;  %v823_v28 = vld [vmem:[#allocation13 + $0x18] sm:$0xff] }
 0x267   :  { %v505_v42 = vadd.f32 %v1062_v6, %v494_v38  ;;  %v511_v43 = vpack.c.bf16 %v2125_v34, %v2127_v37  ;;  %v1535_v6 = vpack.c.bf16 %v608_v19, %v607_v18  ;;  %v1579_v40 = vpack.c.bf16 %v839_v36, %v838_v35  ;;  %v824_v35 = vld [vmem:[#allocation13 + $0x20] sm:$0xff]  ;;  %v825_v36 = vld [vmem:[#allocation13 + $0x28] sm:$0xff] }
 0x268   :  { %v2131_v47 = vmax.f32 %v506_v39, 0.0  ;;  %v1611_v32 = vpack.c.bf16 %v823_v28, %v822_v27 }
 0x269   :  { %v2133_v48 = vmax.f32 %v505_v42, 0.0  ;;  %1284 = vmatpush3.bf16.msra.mxu0 %v511_v43  ;;  %v840_v42 = vld [vmem:[#allocation14 + $0x20] sm:$0xff]  ;;  %v841_v43 = vld [vmem:[#allocation14 + $0x28] sm:$0xff] }
 0x26a   :  { %1512 = vmatprep.subr.bf16.mxu0 %v1511_v41 }
 0x26b   :  { %v512_v51 = vpack.c.bf16 %v2131_v47, %v2133_v48 }
 0x26c   :  { %1286 = vmatmul.mubr.msk.bf16.vlgmr.msra.gmra.mrb[4].mxu0 %vm164_vm1, %v2086_v4  ;;  %v1551_v4 = vpack.c.bf16 %v705_v58, %v704_v57  ;;  %v846_v58 = vld [vmem:[#allocation14 + $0x50] sm:$0xff] }
 0x26d   :  { %1290 = vmatpush3.bf16.msra.mxu1 %v512_v51  ;;  %1514 = vmatpush3.bf16.msra.mxu0 %v1511_v41  ;;  %v842_v51 = vld [vmem:[#allocation14 + $0x30] sm:$0xff] }
 0x26e   :  { %1544 = vmatprep.subr.bf16.mxu1 %v1543_v49  ;;  %1516 = vmatprep.subr.bf16.mxu0 %v1515_v50  ;;  %v1587_v54 = vpack.c.bf16 %v843_v52, %v842_v51  ;;  %v833_v51 = vld [vmem:[#allocation13 + $0x68] sm:$0xff] }
 0x270   :  { %1292 = vmatmul.mubr.msk.bf16.vlgmr.msra.gmra.mrb[12].mxu1 %vm164_vm1, %v2094_v10  ;;  %v709_v10 = vld [vmem:[#allocation11 + $0x48] sm:$0xff] }
 0x271   :  { %1546 = vmatpush3.bf16.msra.mxu1 %v1543_v49  ;;  %1365 = vmatprep.mubr.f32.mxu1 %v2127_v37  ;;  %v1559_v14 = vpack.c.bf16 %v709_v10, %v708_v1  ;;  %v1583_v49 = vpack.c.bf16 %v841_v43, %v840_v42  ;;  %v851_v1 = vld [vmem:[#allocation14 + $0x78] sm:$0xff]  ;;  %v828_v42 = vld [vmem:[#allocation13 + $0x40] sm:$0xff]  ;;  %v829_v43 = vld [vmem:[#allocation13 + $0x48] sm:$0xff] }
 0x272   :  { %1548 = vmatprep.subr.bf16.mxu1 %v1547_v56  ;;  %1518 = vmatpush3.bf16.msra.mxu0 %v1515_v50 }
 0x273   :  { %1520 = vmatprep.subr.bf16.mxu0 %v1519_v59 }
 0x275   :  { %1550 = vmatpush3.bf16.msra.mxu1 %v1547_v56  ;;  %v845_v56 = vld [vmem:[#allocation14 + $0x48] sm:$0xff] }
 0x276   :  { %1552 = vmatprep.subr.bf16.mxu1 %v1551_v4  ;;  %1522 = vmatpush3.bf16.msra.mxu0 %v1519_v59  ;;  %v1591_v57 = vpack.c.bf16 %v845_v56, %v844_v55  ;;  %v847_v59 = vld [vmem:[#allocation14 + $0x58] sm:$0xff]  ;;  %v1066_v55 = vld [vmem:[%s2184_s10] ss:$0 sm:$0xff] }
 0x277   :  { %1524 = vmatprep.subr.bf16.mxu0 %v1523_v3  ;;  %v1595_v60 = vpack.c.bf16 %v847_v59, %v846_v58 }
 0x279   :  { %1554 = vmatpush3.bf16.msra.mxu1 %v1551_v4 }
 0x27a   :  { %1556 = vmatprep.subr.bf16.mxu1 %v1555_v9  ;;  %1526 = vmatpush3.bf16.msra.mxu0 %v1523_v3  ;;  %v848_v3 = vld [vmem:[#allocation14 + $0x60] sm:$0xff] }
 0x27b   :  { %1528 = vmatprep.subr.bf16.mxu0 %v1527_v11  ;;  %v1599_v8 = vpack.c.bf16 %v849_v7, %v848_v3 }
 0x27d   :  { %1558 = vmatpush3.bf16.msra.mxu1 %v1555_v9  ;;  %v850_v9 = vld [vmem:[#allocation14 + $0x70] sm:$0xff] }
 0x27e   :  { %1560 = vmatprep.subr.bf16.mxu1 %v1559_v14  ;;  %1530 = vmatpush3.bf16.msra.mxu0 %v1527_v11  ;;  %v1603_v10 = vpack.c.bf16 %v851_v1, %v850_v9  ;;  %v820_v11 = vld [vmem:[#allocation13] sm:$0xff] }
 0x27f   :  { %1532 = vmatprep.subr.bf16.mxu0 %v1531_v17  ;;  %v1607_v13 = vpack.c.bf16 %v821_v12, %v820_v11 }
 0x281   :  { %1562 = vmatpush3.bf16.msra.mxu1 %v1559_v14 }
 0x282   :  { %1564 = vmatprep.subr.bf16.mxu1 %v1563_v23  ;;  %1534 = vmatpush3.bf16.msra.mxu0 %v1531_v17  ;;  %v1065_v17 = vld [vmem:[%s2181_s7] ss:$0 sm:$0xff] }
 0x283   :  { %1536 = vmatprep.subr.bf16.mxu0 %v1535_v6 }
 0x285   :  { %1566 = vmatpush3.bf16.msra.mxu1 %v1563_v23 }
 0x286   :  { %1568 = vmatprep.subr.bf16.mxu1 %v1567_v26  ;;  %1538 = vmatpush3.bf16.msra.mxu0 %v1535_v6 }
 0x287   :  { %1540 = vmatprep.subr.bf16.mxu0 %v1539_v29 }
 0x289   :  { %1570 = vmatpush3.bf16.msra.mxu1 %v1567_v26 }
 0x28a   :  { %1572 = vmatprep.subr.bf16.mxu1 %v1571_v30  ;;  %1542 = vmatpush3.bf16.msra.mxu0 %v1539_v29 }
 0x28b   :  { %1576 = vmatprep.subr.bf16.mxu0 %v1575_v33 }
 0x28d   :  { %1574 = vmatpush3.bf16.msra.mxu1 %v1571_v30 }
 0x290   :  { %1366 = vmatmul.mubr.f32.vlgmr.msra.gmra.mrb[16].mxu1 %v2125_v34 }
 0x291   :  { %1368 = vmatprep.mubr.f32.mxu1 %v2133_v48 }
 0x294   :  { %1369 = vmatmul.mubr.f32.gmra.mrb[18].mxu1 %v2131_v47 }
 0x33f   :  { %v547_v38 = vpop.f32.mrb[4].mxu0 }
 0x340   :  { %v1287_v39 = vpop.f32.mrb[5].mxu0  ;;  %1327 = vmatprep.mubr.f32.mxu0 %v547_v38 }
 0x341   :  { %v550_v41 = vpop.f32.mrb[6].mxu0  ;;  %v1615_v39 = vpack.c.bf16 %v825_v36, %v824_v35 }
 0x342   :  { %1328 = vmatmul.mubr.f32.vlgmr.msra.gmra.mrb[8].mxu0 %v550_v41  ;;  %v1288_v44 = vpop.f32.mrb[7].mxu0 }
 0x343   :  { %v588_v45 = vpop.f32.mrb[12].mxu1  ;;  %1578 = vmatpush3.bf16.msra.mxu0 %v1575_v33  ;;  %v1623_v44 = vpack.c.bf16 %v829_v43, %v828_v42 }
 0x344   :  { %v1293_v46 = vpop.f32.mrb[13].mxu1  ;;  %1330 = vmatprep.mubr.f32.mxu0 %v588_v45  ;;  %1580 = vmatprep.subr.bf16.mxu0 %v1579_v40  ;;  %v830_v45 = vld [vmem:[#allocation13 + $0x50] sm:$0xff] }
 0x345   :  { %v591_v50 = vpop.f32.mrb[14].mxu1  ;;  %v831_v46 = vld [vmem:[#allocation13 + $0x58] sm:$0xff] }
 0x346   :  { %1331 = vmatmul.mubr.f32.gmra.mrb[10].mxu0 %v591_v50  ;;  %v1294_v53 = vpop.f32.mrb[15].mxu1  ;;  %v832_v50 = vld [vmem:[#allocation13 + $0x60] sm:$0xff] }
 0x347   :  { %1582 = vmatpush3.bf16.msra.mxu0 %v1579_v40  ;;  %v827_v40 = vld [vmem:[#allocation13 + $0x38] sm:$0xff]  ;;  %v1631_v52 = vpack.c.bf16 %v833_v51, %v832_v50  ;;  %v834_v53 = vld [vmem:[#allocation13 + $0x70] sm:$0xff] }
 0x348   :  { %1584 = vmatprep.subr.bf16.mxu0 %v1583_v49 }
 0x34b   :  { %1586 = vmatpush3.bf16.msra.mxu0 %v1583_v49  ;;  %v1627_v49 = vpack.c.bf16 %v831_v46, %v830_v45 }
 0x34c   :  { %1588 = vmatprep.subr.bf16.mxu0 %v1587_v54 }
 0x34f   :  { %1590 = vmatpush3.bf16.msra.mxu0 %v1587_v54  ;;  %v835_v54 = vld [vmem:[#allocation13 + $0x78] sm:$0xff] }
 0x350   :  { %1592 = vmatprep.subr.bf16.mxu0 %v1591_v57 }
 0x353   :  { %1594 = vmatpush3.bf16.msra.mxu0 %v1591_v57 }
 0x354   :  { %1596 = vmatprep.subr.bf16.mxu0 %v1595_v60 }
 0x357   :  { %1598 = vmatpush3.bf16.msra.mxu0 %v1595_v60 }
 0x358   :  { %1600 = vmatprep.subr.bf16.mxu0 %v1599_v8 }
 0x35b   :  { %1602 = vmatpush3.bf16.msra.mxu0 %v1599_v8 }
 0x35c   :  { %1604 = vmatprep.subr.bf16.mxu0 %v1603_v10 }
 0x35f   :  { %1606 = vmatpush3.bf16.msra.mxu0 %v1603_v10 }
 0x360   :  { %1608 = vmatprep.subr.bf16.mxu0 %v1607_v13 }
 0x363   :  { %v1367_v61 = vpop.f32.mrb[16].mxu1 }
 0x364   :  { %v782_v4 = vpop.f32.mrb[17].mxu1 }
 0x367   :  { %v1370_v62 = vpop.f32.mrb[18].mxu1 }
 0x368   :  { %v792_v63 = vpop.f32.mrb[19].mxu1 }
 0x415   :  { %v1329_v14 = vpop.f32.mrb[8].mxu0 }
 0x416   :  { %v697_v15 = vmul.f32 %v1329_v14, %v2114_v22  ;;  %v677_v16 = vpop.f32.mrb[9].mxu0 }
 0x417   :  { %v696_v18 = vmul.f32 %v677_v16, %v2110_v20 }
 0x418   :  { %v802_v19 = vadd.f32 %v1367_v61, %v697_v15 }
 0x419   :  { %v801_v23 = vadd.f32 %v782_v4, %v696_v18  ;;  %v1332_v2 = vpop.f32.mrb[10].mxu0 }
 0x41a   :  { %v813_v5 = vadd.f32 %v1065_v17, %v802_v19  ;;  %v699_v6 = vmul.f32 %v1332_v2, %v2121_v25  ;;  %v687_v0 = vpop.f32.mrb[11].mxu0 }
 0x41b   :  { %v698_v24 = vmul.f32 %v687_v0, %v2112_v21  ;;  %v812_v26 = vadd.f32 %v1065_v17, %v801_v23  ;;  %v826_v21 = vld [vmem:[#allocation13 + $0x30] sm:$0xff] }
 0x41c   :  { %v804_v22 = vadd.f32 %v1370_v62, %v699_v6  ;;  %v817_v31 = vmax.f32 %v813_v5, 0.0  ;;  %v1619_v41 = vpack.c.bf16 %v827_v40, %v826_v21 }
 0x41d   :  { %v803_v29 = vadd.f32 %v792_v63, %v698_v24  ;;  %v816_v30 = vmax.f32 %v812_v26, 0.0 }
 0x41e   :  { %v815_v33 = vadd.f32 %v1065_v17, %v804_v22 }
 0x41f   :  { %1403 = vmatprep.mubr.f32.mxu0 %v816_v30  ;;  %v814_v20 = vadd.f32 %v1065_v17, %v803_v29 }
 0x420   :  { %1404 = vmatmul.mubr.f32.vlgmr.msra.gmra.mrb[12].mxu0 %v817_v31  ;;  %v819_v25 = vmax.f32 %v815_v33, 0.0 }
 0x421   :  { %1610 = vmatpush3.bf16.msra.mxu0 %v1607_v13  ;;  %v818_v38 = vmax.f32 %v814_v20, 0.0 }
 0x422   :  { %1612 = vmatprep.subr.bf16.mxu0 %v1611_v32 }
 0x423   :  { %1406 = vmatprep.mubr.f32.mxu0 %v818_v38 }
 0x424   :  { %1407 = vmatmul.mubr.f32.gmra.mrb[14].mxu0 %v819_v25 }
 0x425   :  { %1614 = vmatpush3.bf16.msra.mxu0 %v1611_v32  ;;  %1441 = vmatprep.mubr.f32.mxu0 %v2127_v37  ;;  %v1635_v37 = vpack.c.bf16 %v835_v54, %v834_v53 }
 0x426   :  { %1616 = vmatprep.subr.bf16.mxu0 %v1615_v39 }
 0x429   :  { %1618 = vmatpush3.bf16.msra.mxu0 %v1615_v39 }
 0x42a   :  { %1620 = vmatprep.subr.bf16.mxu0 %v1619_v41 }
 0x42d   :  { %1622 = vmatpush3.bf16.msra.mxu0 %v1619_v41 }
 0x42e   :  { %1624 = vmatprep.subr.bf16.mxu0 %v1623_v44 }
 0x431   :  { %1626 = vmatpush3.bf16.msra.mxu0 %v1623_v44 }
 0x432   :  { %1628 = vmatprep.subr.bf16.mxu0 %v1627_v49 }
 0x435   :  { %1630 = vmatpush3.bf16.msra.mxu0 %v1627_v49 }
 0x436   :  { %1632 = vmatprep.subr.bf16.mxu0 %v1631_v52 }
 0x439   :  { %1634 = vmatpush3.bf16.msra.mxu0 %v1631_v52 }
 0x43a   :  { %1636 = vmatprep.subr.bf16.mxu0 %v1635_v37 }
 0x43d   :  { %1638 = vmatpush3.bf16.msra.mxu0 %v1635_v37 }
 0x440   :  { %1442 = vmatmul.mubr.f32.vlgmr.msra.gmra.mrb[12].mxu0 %v2125_v34 }
 0x441   :  { %1444 = vmatprep.mubr.f32.mxu0 %v2133_v48 }
 0x444   :  { %1445 = vmatmul.mubr.f32.gmra.mrb[14].mxu0 %v2131_v47 }
 0x513   :  { %v1443_v56 = vpop.f32.mrb[12].mxu0 }
 0x514   :  { %v1030_v57 = vadd.f32 %v1443_v56, %v1066_v55  ;;  %v1003_v58 = vpop.f32.mrb[13].mxu0 }
 0x515   :  { %v1029_v59 = vadd.f32 %v1066_v55, %v1003_v58 }
 0x516   :  { %1034 = vst [vmem:[#allocation16 + $0x8] sm:$0xff] %v1030_v57 }
 0x517   :  { %1033 = vst [vmem:[#allocation16] sm:$0xff] %v1029_v59  ;;  %v1446_v60 = vpop.f32.mrb[14].mxu0 }
 0x518   :  { %v1032_v61 = vadd.f32 %v1446_v60, %v1066_v55  ;;  %v1013_v4 = vpop.f32.mrb[15].mxu0 }
 0x519   :  { %v1031_v34 = vadd.f32 %v1066_v55, %v1013_v4 }
 0x51a   :  { %1036 = vst [vmem:[#allocation16 + $0x18] sm:$0xff] %v1032_v61 }
 0x51b   :  { %1035 = vst [vmem:[#allocation16 + $0x10] sm:$0xff] %v1031_v34 }
 0x51c   :  { %1858 = shalt.err (!%p1855_p12)
}
 0x51d   :  { %s1859_s21 = scalar_lea.hbm %s2185_s11, 512 }
 0x51e   :  { %p1860_p13 = scmp.ne.s32.totalorder %s2185_s11, %s1859_s21  ;;  %p1863_p0 = scmp.lt.u32.totalorder %s1859_s21, %s2185_s11 }
 0x520   :  { %p1865_p1 = pnand %p1863_p0, %p1860_p13 }
 0x522   :  { %1868 = shalt.err (!%p1865_p1)
}
 0x523   :  { %1048 = dma.vmem_to_hbm [thread:$0]  %s1043_s3, 512, %s2185_s11, [#allocation4], %s1886_s18, %s1886_s18, %s1887_s24  }
 0x524   :  { %1879 = dma.done.wait [#allocation4], 512  }
 0x525   :  { %1880 = vsyncadd [#allocation4], 4294966784 }
 0x526   :  { %1052 = vsyncpa [#allocation3], 1 }
 0x527   :  { %1053 = vsyncpa [#allocation6], 1 }
 0x528   :  { %1054 = vsyncpa [#allocation9], 1 }
 0x529   :  { %1055 = vsyncpa [#allocation12], 1 }
 0x52a   :  { %1056 = vsyncpa [#allocation15], 1 }
 0x52b   :  { %1057 = vsyncpa [#allocation4], 1 }

// kernel: tpu_custom_call.1
= control target key start
LH: loop header
LB: loop body
LE: loop exit
PB: predicated region body
PF: predicated region fallthrough
CT: control target
= control target key end

     0   :  { %16 = vsyncpa [#allocation3], 0  ;;  %s2174_s0 = inlined_call_operand.hbm [shape: f32[2,16,128], index: 0, kind: input, shape index: {}]   ;;  %s2175_s1 = inlined_call_operand.hbm [shape: bf16[2,16,16], index: 1, kind: input, shape index: {}]   ;;  %s2176_s2 = inlined_call_operand.hbm [shape: f32[128,128], index: 2, kind: input, shape index: {}]   ;;  %s2177_s3 = inlined_call_operand.hbm [shape: f32[128,128], index: 3, kind: input, shape index: {}]   ;;  %s2178_s4 = inlined_call_operand.vmem [shape: f32[1,128], index: 4, kind: input, shape index: {}]   ;;  %s2179_s5 = inlined_call_operand.hbm [shape: f32[128,128], index: 5, kind: input, shape index: {}]   ;;  %s2180_s6 = inlined_call_operand.hbm [shape: f32[128,128], index: 6, kind: input, shape index: {}]   ;;  %s2181_s7 = inlined_call_operand.vmem [shape: f32[1,128], index: 7, kind: input, shape index: {}]   ;;  %s2182_s8 = inlined_call_operand.hbm [shape: f32[128,128], index: 8, kind: input, shape index: {}]   ;;  %s2183_s9 = inlined_call_operand.hbm [shape: f32[128,128], index: 9, kind: input, shape index: {}]   ;;  %s2184_s10 = inlined_call_operand.vmem [shape: f32[1,128], index: 10, kind: input, shape index: {}]   ;;  %s2185_s11 = inlined_call_operand.hbm [shape: f32[2,16,128], index: 11, kind: output, shape index: {}]  }
   0x1   :  { %17 = vsyncpa [#allocation6], 0 }
   0x2   :  { %18 = vsyncpa [#allocation9], 0 }
   0x3   :  { %19 = vsyncpa [#allocation12], 0 }
   0x4   :  { %20 = vsyncpa [#allocation15], 0 }
   0x5   :  { %21 = vsyncpa [#allocation4], 0  ;;  %s1881_s17 = smov [#allocation5]   ;;  %s1671_s21 = scalar_lea.hbm %s2175_s1, 256 }
   0x6   :  { %s39_s18 = sshll.u32 %s1881_s17, 4  ;;  %p1672_p0 = scmp.ne.s32.totalorder %s2175_s1, %s1671_s21  ;;  %s40_s18 = int_to_ptr.vmem [resolvable:$true] %s39_s18 }
   0x7   :  { %p1675_p1 = scmp.lt.u32.totalorder %s1671_s21, %s2175_s1 }
   0x9   :  { %p1677_p2 = pnand %p1675_p1, %p1672_p0 }
   0xb   :  { %1680 = shalt.err (!%p1677_p2)
}
   0xc   :  { %s1681_s26 = scalar_lea.vmem %s40_s18, 256  ;;  %p1686_p4 = scmp.lt.s32.totalorder %s40_s18, %s40_s18 }
   0xd   :  { %p1682_p3 = scmp.ne.s32.totalorder %s40_s18, %s1681_s26  ;;  %p1687_p5 = scmp.lt.s32.totalorder %s1681_s26, %s1681_s26 }
   0xf   :  { %p1688_p6 = por %p1687_p5, %p1686_p4 }
  0x11   :  { %p1689_p7 = pnand %p1688_p6, %p1682_p3 }
  0x13   :  { %1692 = shalt.err (!%p1689_p7)
}
  0x14   :  { %s1882_s27 = smov 64   ;;  %s1883_s28 = smov 4  }
  0x15   :  { %45 = dma.hbm_to_vmem [thread:$0]  %s2175_s1, 256, %s40_s18, [#allocation6], %s1882_s27, %s1882_s27, %s1883_s28  }
  0x16   :  { %s1884_s12 = smov [#allocation8]   ;;  %s1885_s14 = smov [#allocation11]  }
  0x17   :  { %s63_s13 = sshll.u32 %s1884_s12, 4  ;;  %s89_s15 = sshll.u32 %s1885_s14, 4  ;;  %s64_s13 = int_to_ptr.vmem [resolvable:$true] %s63_s13  ;;  %s90_s15 = int_to_ptr.vmem [resolvable:$true] %s89_s15 }
  0x18   :  { %s1693_s19 = scalar_lea.hbm %s2177_s3, 2048 }
  0x19   :  { %p1694_p8 = scmp.ne.s32.totalorder %s2177_s3, %s1693_s19  ;;  %p1697_p9 = scmp.lt.u32.totalorder %s1693_s19, %s2177_s3 }
  0x1b   :  { %p1699_p10 = pnand %p1697_p9, %p1694_p8 }
  0x1d   :  { %1702 = shalt.err (!%p1699_p10)
}
  0x1e   :  { %s1703_s1 = scalar_lea.vmem %s64_s13, 2048  ;;  %p1708_p12 = scmp.lt.s32.totalorder %s64_s13, %s64_s13 }
  0x1f   :  { %p1704_p11 = scmp.ne.s32.totalorder %s64_s13, %s1703_s1  ;;  %p1709_p13 = scmp.lt.s32.totalorder %s1703_s1, %s1703_s1 }
  0x21   :  { %p1710_p0 = por %p1709_p13, %p1708_p12 }
  0x23   :  { %p1711_p1 = pnand %p1710_p0, %p1704_p11 }
  0x25   :  { %1714 = shalt.err (!%p1711_p1)
}
  0x26   :  { %s1886_s18 = smov 128   ;;  %s1887_s24 = smov 8  }
  0x27   :  { %69 = dma.hbm_to_vmem [thread:$0]  %s2177_s3, 2048, %s64_s13, [#allocation9], %s1886_s18, %s1886_s18, %s1887_s24  }
  0x28   :  { %s1715_s29 = scalar_lea.hbm %s2180_s6, 2048 }
  0x29   :  { %p1716_p2 = scmp.ne.s32.totalorder %s2180_s6, %s1715_s29  ;;  %p1719_p3 = scmp.lt.u32.totalorder %s1715_s29, %s2180_s6 }
  0x2b   :  { %p1721_p4 = pnand %p1719_p3, %p1716_p2 }
  0x2d   :  { %1724 = shalt.err (!%p1721_p4)
}
  0x2e   :  { %s1725_s17 = scalar_lea.vmem %s90_s15, 2048  ;;  %p1730_p6 = scmp.lt.s32.totalorder %s90_s15, %s90_s15 }
  0x2f   :  { %p1726_p5 = scmp.ne.s32.totalorder %s90_s15, %s1725_s17  ;;  %p1731_p7 = scmp.lt.s32.totalorder %s1725_s17, %s1725_s17 }
  0x31   :  { %p1732_p8 = por %p1731_p7, %p1730_p6 }
  0x33   :  { %p1733_p9 = pnand %p1732_p8, %p1726_p5 }
  0x35   :  { %1736 = shalt.err (!%p1733_p9)
}
  0x36   :  { %95 = dma.hbm_to_vmem [thread:$0]  %s2180_s6, 2048, %s90_s15, [#allocation12], %s1886_s18, %s1886_s18, %s1887_s24  }
  0x37   :  { %s1888_s19 = smov [#allocation2]   ;;  %s1889_s21 = smov [#allocation7]  }
  0x38   :  { %s27_s20 = sshll.u32 %s1888_s19, 4  ;;  %s51_s22 = sshll.u32 %s1889_s21, 4  ;;  %s28_s20 = int_to_ptr.vmem [resolvable:$true] %s27_s20  ;;  %s52_s22 = int_to_ptr.vmem [resolvable:$true] %s51_s22 }
  0x39   :  { %s1737_s25 = scalar_lea.hbm %s2174_s0, 512 }
  0x3a   :  { %p1738_p10 = scmp.ne.s32.totalorder %s2174_s0, %s1737_s25  ;;  %p1741_p11 = scmp.lt.u32.totalorder %s1737_s25, %s2174_s0 }
  0x3c   :  { %p1743_p12 = pnand %p1741_p11, %p1738_p10 }
  0x3e   :  { %1746 = shalt.err (!%p1743_p12)
}
  0x3f   :  { %s1747_s6 = scalar_lea.vmem %s28_s20, 512  ;;  %p1752_p0 = scmp.lt.s32.totalorder %s28_s20, %s28_s20 }
  0x40   :  { %p1748_p13 = scmp.ne.s32.totalorder %s28_s20, %s1747_s6  ;;  %p1753_p1 = scmp.lt.s32.totalorder %s1747_s6, %s1747_s6 }
  0x42   :  { %p1754_p2 = por %p1753_p1, %p1752_p0 }
  0x44   :  { %p1755_p3 = pnand %p1754_p2, %p1748_p13 }
  0x46   :  { %1758 = shalt.err (!%p1755_p3)
}
  0x47   :  { %33 = dma.hbm_to_vmem [thread:$0]  %s2174_s0, 512, %s28_s20, [#allocation3], %s1886_s18, %s1886_s18, %s1887_s24  }
  0x48   :  { %s1759_s16 = scalar_lea.hbm %s2176_s2, 2048 }
  0x49   :  { %p1760_p4 = scmp.ne.s32.totalorder %s2176_s2, %s1759_s16  ;;  %p1763_p5 = scmp.lt.u32.totalorder %s1759_s16, %s2176_s2 }
  0x4b   :  { %p1765_p6 = pnand %p1763_p5, %p1760_p4 }
  0x4d   :  { %1768 = shalt.err (!%p1765_p6)
}
  0x4e   :  { %s1769_s21 = scalar_lea.vmem %s52_s22, 2048  ;;  %p1774_p8 = scmp.lt.s32.totalorder %s52_s22, %s52_s22 }
  0x4f   :  { %p1770_p7 = scmp.ne.s32.totalorder %s52_s22, %s1769_s21  ;;  %p1775_p9 = scmp.lt.s32.totalorder %s1769_s21, %s1769_s21 }
  0x51   :  { %p1776_p10 = por %p1775_p9, %p1774_p8 }
  0x53   :  { %p1777_p11 = pnand %p1776_p10, %p1770_p7 }
  0x55   :  { %1780 = shalt.err (!%p1777_p11)
}
  0x56   :  { %57 = dma.hbm_to_vmem [thread:$0]  %s2176_s2, 2048, %s52_s22, [#allocation6], %s1886_s18, %s1886_s18, %s1887_s24  }
  0x57   :  { %s1890_s23 = smov [#allocation10]   ;;  %s1891_s25 = smov [#allocation13]  }
  0x58   :  { %s77_s1 = sshll.u32 %s1890_s23, 4  ;;  %s103_s26 = sshll.u32 %s1891_s25, 4  ;;  %s78_s1 = int_to_ptr.vmem [resolvable:$true] %s77_s1  ;;  %s104_s26 = int_to_ptr.vmem [resolvable:$true] %s103_s26 }
  0x59   :  { %s1781_s29 = scalar_lea.hbm %s2179_s5, 2048 }
  0x5a   :  { %p1782_p12 = scmp.ne.s32.totalorder %s2179_s5, %s1781_s29  ;;  %p1785_p13 = scmp.lt.u32.totalorder %s1781_s29, %s2179_s5 }
  0x5c   :  { %p1787_p0 = pnand %p1785_p13, %p1782_p12 }
  0x5e   :  { %1790 = shalt.err (!%p1787_p0)
}
  0x5f   :  { %s1791_s2 = scalar_lea.vmem %s78_s1, 2048  ;;  %p1796_p2 = scmp.lt.s32.totalorder %s78_s1, %s78_s1 }
  0x60   :  { %p1792_p1 = scmp.ne.s32.totalorder %s78_s1, %s1791_s2  ;;  %p1797_p3 = scmp.lt.s32.totalorder %s1791_s2, %s1791_s2 }
  0x62   :  { %p1798_p4 = por %p1797_p3, %p1796_p2 }
  0x64   :  { %p1799_p5 = pnand %p1798_p4, %p1792_p1 }
  0x66   :  { %1802 = shalt.err (!%p1799_p5)
}
  0x67   :  { %83 = dma.hbm_to_vmem [thread:$0]  %s2179_s5, 2048, %s78_s1, [#allocation9], %s1886_s18, %s1886_s18, %s1887_s24  }
  0x68   :  { %s1803_s3 = scalar_lea.hbm %s2182_s8, 2048 }
  0x69   :  { %p1804_p6 = scmp.ne.s32.totalorder %s2182_s8, %s1803_s3  ;;  %p1807_p7 = scmp.lt.u32.totalorder %s1803_s3, %s2182_s8 }
  0x6b   :  { %p1809_p8 = pnand %p1807_p7, %p1804_p6 }
  0x6d   :  { %1812 = shalt.err (!%p1809_p8)
}
  0x6e   :  { %s1813_s20 = scalar_lea.vmem %s104_s26, 2048  ;;  %p1818_p10 = scmp.lt.s32.totalorder %s104_s26, %s104_s26 }
  0x6f   :  { %p1814_p9 = scmp.ne.s32.totalorder %s104_s26, %s1813_s20  ;;  %p1819_p11 = scmp.lt.s32.totalorder %s1813_s20, %s1813_s20 }
  0x71   :  { %p1820_p12 = por %p1819_p11, %p1818_p10 }
  0x73   :  { %p1821_p13 = pnand %p1820_p12, %p1814_p9 }
  0x75   :  { %1824 = shalt.err (!%p1821_p13)
}
  0x76   :  { %109 = dma.hbm_to_vmem [thread:$0]  %s2182_s8, 2048, %s104_s26, [#allocation12], %s1886_s18, %s1886_s18, %s1887_s24  }
  0x77   :  { %s1892_s1 = smov [#allocation14]   ;;  %s1825_s29 = scalar_lea.hbm %s2183_s9, 2048 }
  0x78   :  { %s115_s25 = sshll.u32 %s1892_s1, 4  ;;  %p1826_p0 = scmp.ne.s32.totalorder %s2183_s9, %s1825_s29  ;;  %s116_s25 = int_to_ptr.vmem [resolvable:$true] %s115_s25 }
  0x79   :  { %p1829_p1 = scmp.lt.u32.totalorder %s1825_s29, %s2183_s9 }
  0x7b   :  { %p1831_p2 = pnand %p1829_p1, %p1826_p0 }
  0x7d   :  { %1834 = shalt.err (!%p1831_p2)
}
  0x7e   :  { %s1835_s2 = scalar_lea.vmem %s116_s25, 2048  ;;  %p1840_p4 = scmp.lt.s32.totalorder %s116_s25, %s116_s25 }
  0x7f   :  { %p1836_p3 = scmp.ne.s32.totalorder %s116_s25, %s1835_s2  ;;  %p1841_p5 = scmp.lt.s32.totalorder %s1835_s2, %s1835_s2 }
  0x81   :  { %p1842_p6 = por %p1841_p5, %p1840_p4 }
  0x83   :  { %p1843_p7 = pnand %p1842_p6, %p1836_p3 }
  0x85   :  { %1846 = shalt.err (!%p1843_p7)
}
  0x86   :  { %121 = dma.hbm_to_vmem [thread:$0]  %s2183_s9, 2048, %s116_s25, [#allocation15], %s1886_s18, %s1886_s18, %s1887_s24  }
  0x87   :  { %1869 = dma.done.wait [#allocation3], 512  }
  0x88   :  { %1870 = vsyncadd [#allocation3], 4294966784 }
  0x89   :  { %1871 = dma.done.wait [#allocation6], 2304  }
  0x8a   :  { %1872 = vsyncadd [#allocation6], 4294964992 }
  0x8b   :  { %1873 = dma.done.wait [#allocation9], 4096  }
  0x8c   :  { %1874 = vsyncadd [#allocation9], 4294963200 }
  0x8d   :  { %1875 = dma.done.wait [#allocation12], 4096  }
  0x8e   :  { %1876 = vsyncadd [#allocation12], 4294963200 }
  0x8f   :  { %1877 = dma.done.wait [#allocation15], 2048  }
  0x90   :  { %1878 = vsyncadd [#allocation15], 4294965248  ;;  %v1893_v0 = vmov 0.0   ;;  %vm1894_vm0 = vmmov 0   ;;  %v2080_v1 = vld [vmem:[#allocation2] sm:$0xff]  ;;  %v2082_v2 = vld [vmem:[#allocation2 + $0x8] sm:$0xff] }
  0x91   :  { %1195 = vmatprep.subr.bf16.mxu0 %v1893_v0  ;;  %1197 = vmatprep.mubr.msk.bf16.mxu0 %vm1894_vm0, %v1893_v0  ;;  %v157_v3 = vpack.c.bf16 %v2082_v2, %v2080_v1  ;;  %v2086_v4 = vld [vmem:[#allocation5] sm:$0xff]   ;;  %v2088_v5 = vld [vmem:[#allocation2 + $0x10] sm:$0xff]  ;;  %v2090_v6 = vld [vmem:[#allocation2 + $0x18] sm:$0xff]  ;;  %vm164_vm1 = vcmask 130048   ;;  %v1895_v36 = vmov 8   ;;  %s1896_s17 = smov [#allocation16]  }
  0x92   :  { %1201 = vmatprep.subr.bf16.mxu1 %v1893_v0  ;;  %1203 = vmatprep.mubr.msk.bf16.mxu1 %vm1894_vm0, %v1893_v0  ;;  %v158_v7 = vpack.c.bf16 %v2090_v6, %v2088_v5  ;;  %v266_v8 = vld [vmem:[#allocation7] sm:$0xff]  ;;  %v267_v9 = vld [vmem:[#allocation7 + $0x8] sm:$0xff]  ;;  %v2094_v10 = vld [vmem:[#allocation5 + $0x8] sm:$0xff]   ;;  %s1042_s3 = sshll.u32 %s1896_s17, 4  ;;  %s1043_s3 = int_to_ptr.vmem [resolvable:$true] %s1042_s3 }
  0x93   :  { %1196 = vmatpush3.bf16.msra.mxu0 %v157_v3  ;;  %v1447_v11 = vpack.c.bf16 %v267_v9, %v266_v8  ;;  %v268_v12 = vld [vmem:[#allocation7 + $0x10] sm:$0xff]  ;;  %v269_v13 = vld [vmem:[#allocation7 + $0x18] sm:$0xff]  ;;  %v270_v15 = vld [vmem:[#allocation7 + $0x20] sm:$0xff]  ;;  %1659 = vset.pattern.permute.xlu0 %v1895_v36  ;;  %s1847_s13 = scalar_lea.vmem %s1043_s3, 512  ;;  %p1852_p9 = scmp.lt.s32.totalorder %s1043_s3, %s1043_s3 }
  0x94   :  { %1283 = vmatprep.subr.bf16.mxu0 %v1893_v0  ;;  %1202 = vmatpush3.bf16.msra.mxu1 %v158_v7  ;;  %v1451_v14 = vpack.c.bf16 %v269_v13, %v268_v12  ;;  %v271_v16 = vld [vmem:[#allocation7 + $0x28] sm:$0xff]  ;;  %v272_v18 = vld [vmem:[#allocation7 + $0x30] sm:$0xff]  ;;  %v273_v19 = vld [vmem:[#allocation7 + $0x38] sm:$0xff]  ;;  %p1848_p8 = scmp.ne.s32.totalorder %s1043_s3, %s1847_s13  ;;  %p1853_p10 = scmp.lt.s32.totalorder %s1847_s13, %s1847_s13 }
  0x95   :  { %1448 = vmatprep.subr.bf16.mxu1 %v1447_v11  ;;  %v1455_v17 = vpack.c.bf16 %v271_v16, %v270_v15  ;;  %v1459_v20 = vpack.c.bf16 %v273_v19, %v272_v18  ;;  %v274_v21 = vld [vmem:[#allocation7 + $0x40] sm:$0xff]  ;;  %v275_v22 = vld [vmem:[#allocation7 + $0x48] sm:$0xff]  ;;  %v276_v24 = vld [vmem:[#allocation7 + $0x50] sm:$0xff]  ;;  %1660 = vset.pattern.permute.xlu1 %v1895_v36 }
  0x96   :  { %1198 = vmatmul.mubr.msk.bf16.vlgmr.msra.gmra.mrb[0].mxu0 %vm164_vm1, %v2086_v4  ;;  %v1463_v23 = vpack.c.bf16 %v275_v22, %v274_v21  ;;  %v277_v25 = vld [vmem:[#allocation7 + $0x58] sm:$0xff]  ;;  %v278_v27 = vld [vmem:[#allocation7 + $0x60] sm:$0xff]  ;;  %v279_v28 = vld [vmem:[#allocation7 + $0x68] sm:$0xff]  ;;  %p1854_p11 = por %p1853_p10, %p1852_p9 }
  0x97   :  { %1285 = vmatprep.mubr.msk.bf16.mxu0 %vm1894_vm0, %v1893_v0  ;;  %1204 = vmatmul.mubr.msk.bf16.vlgmr.msra.gmra.mrb[0].mxu1 %vm164_vm1, %v2094_v10  ;;  %v1467_v26 = vpack.c.bf16 %v277_v25, %v276_v24  ;;  %v1471_v29 = vpack.c.bf16 %v279_v28, %v278_v27  ;;  %v280_v30 = vld [vmem:[#allocation7 + $0x70] sm:$0xff]  ;;  %v281_v31 = vld [vmem:[#allocation7 + $0x78] sm:$0xff]  ;;  %v391_v33 = vld [vmem:[#allocation8] sm:$0xff] }
  0x98   :  { %1450 = vmatpush3.bf16.msra.mxu1 %v1447_v11  ;;  %v1475_v32 = vpack.c.bf16 %v281_v31, %v280_v30  ;;  %v392_v34 = vld [vmem:[#allocation8 + $0x8] sm:$0xff]  ;;  %v393_v37 = vld [vmem:[#allocation8 + $0x10] sm:$0xff]  ;;  %v394_v38 = vld [vmem:[#allocation8 + $0x18] sm:$0xff]  ;;  %p1855_p12 = pnand %p1854_p11, %p1848_p8 }
  0x99   :  { %1452 = vmatprep.subr.bf16.mxu1 %v1451_v14  ;;  %v1479_v35 = vpack.c.bf16 %v392_v34, %v391_v33  ;;  %v1483_v42 = vpack.c.bf16 %v394_v38, %v393_v37  ;;  %v395_v45 = vld [vmem:[#allocation8 + $0x20] sm:$0xff]  ;;  %v396_v46 = vld [vmem:[#allocation8 + $0x28] sm:$0xff]  ;;  %v397_v55 = vld [vmem:[#allocation8 + $0x30] sm:$0xff] }
  0x9a   :  { %v1487_v53 = vpack.c.bf16 %v396_v46, %v395_v45  ;;  %v398_v56 = vld [vmem:[#allocation8 + $0x38] sm:$0xff]  ;;  %v399_v58 = vld [vmem:[#allocation8 + $0x40] sm:$0xff]  ;;  %v400_v59 = vld [vmem:[#allocation8 + $0x48] sm:$0xff] }
  0x9b   :  { %v1491_v57 = vpack.c.bf16 %v398_v56, %v397_v55  ;;  %v1495_v61 = vpack.c.bf16 %v400_v59, %v399_v58  ;;  %v401_v62 = vld [vmem:[#allocation8 + $0x50] sm:$0xff]  ;;  %v402_v63 = vld [vmem:[#allocation8 + $0x58] sm:$0xff]  ;;  %v404_v11 = vld [vmem:[#allocation8 + $0x68] sm:$0xff] }
  0x9c   :  { %1454 = vmatpush3.bf16.msra.mxu1 %v1451_v14  ;;  %v1499_v8 = vpack.c.bf16 %v402_v63, %v401_v62  ;;  %v405_v13 = vld [vmem:[#allocation8 + $0x70] sm:$0xff]  ;;  %v406_v14 = vld [vmem:[#allocation8 + $0x78] sm:$0xff]  ;;  %v596_v33 = vld [vmem:[#allocation10 + $0x8] sm:$0xff] }
  0x9d   :  { %1456 = vmatprep.subr.bf16.mxu1 %v1455_v17  ;;  %v1507_v15 = vpack.c.bf16 %v406_v14, %v405_v13  ;;  %v597_v45 = vld [vmem:[#allocation10 + $0x10] sm:$0xff]  ;;  %v598_v46 = vld [vmem:[#allocation10 + $0x18] sm:$0xff]  ;;  %v600_v55 = vld [vmem:[#allocation10 + $0x28] sm:$0xff] }
  0x9e   :  { %v705_v58 = vld [vmem:[#allocation11 + $0x28] sm:$0xff]  ;;  %v706_v62 = vld [vmem:[#allocation11 + $0x30] sm:$0xff]  ;;  %v707_v63 = vld [vmem:[#allocation11 + $0x38] sm:$0xff] }
  0x9f   :  { %v606_v13 = vld [vmem:[#allocation10 + $0x58] sm:$0xff] }
  0xa0   :  { %1458 = vmatpush3.bf16.msra.mxu1 %v1455_v17 }
  0xa1   :  { %1460 = vmatprep.subr.bf16.mxu1 %v1459_v20 }
  0xa4   :  { %1462 = vmatpush3.bf16.msra.mxu1 %v1459_v20 }
  0xa5   :  { %1464 = vmatprep.subr.bf16.mxu1 %v1463_v23 }
  0xa8   :  { %1466 = vmatpush3.bf16.msra.mxu1 %v1463_v23 }
  0xa9   :  { %1468 = vmatprep.subr.bf16.mxu1 %v1467_v26 }
  0xac   :  { %1470 = vmatpush3.bf16.msra.mxu1 %v1467_v26 }
  0xad   :  { %1472 = vmatprep.subr.bf16.mxu1 %v1471_v29 }
  0xb0   :  { %1474 = vmatpush3.bf16.msra.mxu1 %v1471_v29 }
  0xb1   :  { %1476 = vmatprep.subr.bf16.mxu1 %v1475_v32 }
  0xb4   :  { %1478 = vmatpush3.bf16.msra.mxu1 %v1475_v32  ;;  %v595_v32 = vld [vmem:[#allocation10] sm:$0xff] }
  0xb5   :  { %1480 = vmatprep.subr.bf16.mxu1 %v1479_v35 }
 0x169   :  { %v202_v39 = vpop.f32.mrb[0].mxu0 }
 0x16a   :  { %v258_v40 = vmax.f32 %v202_v39, 1.0  ;;  %v1199_v41 = vpop.f32.mrb[1].mxu0  ;;  %1239 = vmatprep.mubr.f32.mxu1 %v202_v39  ;;  %v251_v44 = vpop.f32.mrb[0].mxu1 }
 0x16b   :  { %v205_v43 = vpop.f32.mrb[2].mxu0  ;;  %v260_v49 = vmax.f32 %v251_v44, 1.0  ;;  %v1205_v50 = vpop.f32.mrb[1].mxu1  ;;  %v1511_v41 = vpack.c.bf16 %v596_v33, %v595_v32  ;;  %v837_v32 = vld [vmem:[#allocation14 + $0x8] sm:$0xff] }
 0x16c   :  { %1663 = vrcp.f32 %v258_v40  ;;  %v259_v47 = vmax.f32 %v205_v43, 1.0  ;;  %v1200_v48 = vpop.f32.mrb[3].mxu0  ;;  %1240 = vmatmul.mubr.f32.vlgmr.msra.gmra.mrb[4].mxu1 %v205_v43  ;;  %v254_v51 = vpop.f32.mrb[2].mxu1  ;;  %v700_v40 = vld [vmem:[#allocation11] sm:$0xff]  ;;  %v1515_v50 = vpack.c.bf16 %v598_v46, %v597_v45 }
 0x16d   :  { %1482 = vmatpush3.bf16.msra.mxu1 %v1479_v35  ;;  %1242 = vmatprep.mubr.f32.mxu1 %v251_v44  ;;  %v261_v52 = vmax.f32 %v254_v51, 1.0  ;;  %v1206_v54 = vpop.f32.mrb[3].mxu1  ;;  %1665 = vrcp.f32 %v260_v49  ;;  %v701_v44 = vld [vmem:[#allocation11 + $0x8] sm:$0xff] }
 0x16e   :  { %1484 = vmatprep.subr.bf16.mxu1 %v1483_v42  ;;  %1667 = vrcp.f32 %v259_v47  ;;  %v1543_v49 = vpack.c.bf16 %v701_v44, %v700_v40  ;;  %v599_v54 = vld [vmem:[#allocation10 + $0x20] sm:$0xff] }
 0x16f   :  { %1669 = vrcp.f32 %v261_v52  ;;  %v702_v52 = vld [vmem:[#allocation11 + $0x10] sm:$0xff]  ;;  %v1519_v59 = vpack.c.bf16 %v600_v55, %v599_v54  ;;  %v844_v55 = vld [vmem:[#allocation14 + $0x40] sm:$0xff] }
 0x170   :  { %1243 = vmatmul.mubr.f32.gmra.mrb[6].mxu1 %v254_v51 }
 0x171   :  { %1486 = vmatpush3.bf16.msra.mxu1 %v1483_v42  ;;  %1277 = vmatprep.mubr.f32.mxu1 %v2080_v1  ;;  %v403_v1 = vld [vmem:[#allocation8 + $0x60] sm:$0xff] }
 0x172   :  { %1488 = vmatprep.subr.bf16.mxu1 %v1487_v53  ;;  %v1503_v12 = vpack.c.bf16 %v404_v11, %v403_v1  ;;  %v708_v1 = vld [vmem:[#allocation11 + $0x40] sm:$0xff] }
 0x175   :  { %1490 = vmatpush3.bf16.msra.mxu1 %v1487_v53  ;;  %v703_v53 = vld [vmem:[#allocation11 + $0x18] sm:$0xff] }
 0x176   :  { %v1664_v60 = vpop.eup %1663  ;;  %1492 = vmatprep.subr.bf16.mxu1 %v1491_v57  ;;  %v1547_v56 = vpack.c.bf16 %v703_v53, %v702_v52  ;;  %v843_v52 = vld [vmem:[#allocation14 + $0x38] sm:$0xff] }
 0x177   :  { %369 = vperm.xlu0 %1659, %v1664_v60   ;;  %v1666_v3 = vpop.eup %1665  ;;  %v601_v60 = vld [vmem:[#allocation10 + $0x30] sm:$0xff] }
 0x178   :  { %v1668_v7 = vpop.eup %1667  ;;  %379 = vperm.xlu1 %1660, %v1666_v3  }
 0x179   :  { %1494 = vmatpush3.bf16.msra.mxu1 %v1491_v57  ;;  %v1670_v9 = vpop.eup %1669  ;;  %v704_v57 = vld [vmem:[#allocation11 + $0x20] sm:$0xff] }
 0x17a   :  { %1496 = vmatprep.subr.bf16.mxu1 %v1495_v61 }
 0x17b   :  { %374 = vperm.xlu0 %1659, %v1668_v7   ;;  %v603_v7 = vld [vmem:[#allocation10 + $0x40] sm:$0xff] }
 0x17c   :  { %384 = vperm.xlu1 %1660, %v1670_v9   ;;  %v1555_v9 = vpack.c.bf16 %v707_v63, %v706_v62 }
 0x17d   :  { %1498 = vmatpush3.bf16.msra.mxu1 %v1495_v61  ;;  %v602_v61 = vld [vmem:[#allocation10 + $0x38] sm:$0xff] }
 0x17e   :  { %1500 = vmatprep.subr.bf16.mxu1 %v1499_v8  ;;  %v1523_v3 = vpack.c.bf16 %v602_v61, %v601_v60 }
 0x181   :  { %1502 = vmatpush3.bf16.msra.mxu1 %v1499_v8  ;;  %v604_v8 = vld [vmem:[#allocation10 + $0x48] sm:$0xff] }
 0x182   :  { %1504 = vmatprep.subr.bf16.mxu1 %v1503_v12  ;;  %v1527_v11 = vpack.c.bf16 %v604_v8, %v603_v7  ;;  %v849_v7 = vld [vmem:[#allocation14 + $0x68] sm:$0xff] }
 0x185   :  { %1506 = vmatpush3.bf16.msra.mxu1 %v1503_v12  ;;  %v605_v12 = vld [vmem:[#allocation10 + $0x50] sm:$0xff] }
 0x186   :  { %1508 = vmatprep.subr.bf16.mxu1 %v1507_v15 }
 0x189   :  { %1510 = vmatpush3.bf16.msra.mxu1 %v1507_v15  ;;  %v710_v15 = vld [vmem:[#allocation11 + $0x50] sm:$0xff] }
 0x18a   :  { %1289 = vmatprep.subr.bf16.mxu1 %v1893_v0 }
 0x18c   :  { %1278 = vmatmul.mubr.f32.vlgmr.msra.gmra.mrb[8].mxu1 %v2082_v2 }
 0x18d   :  { %1280 = vmatprep.mubr.f32.mxu1 %v2088_v5 }
 0x190   :  { %1281 = vmatmul.mubr.f32.gmra.mrb[10].mxu1 %v2090_v6  ;;  %v1062_v6 = vld [vmem:[%s2178_s4] ss:$0 sm:$0xff] }
 0x191   :  { %1291 = vmatprep.mubr.msk.bf16.mxu1 %vm1894_vm0, %v1893_v0 }
 0x1f6   :  { %v2110_v20 = vpop.permute.xlu0 %369 }
 0x1f7   :  { %v2112_v21 = vpop.permute.xlu1 %379 }
 0x1fa   :  { %v2114_v22 = vpop.permute.xlu0 %374 }
 0x1fb   :  { %v2121_v25 = vpop.permute.xlu1 %384 }
 0x23f   :  { %v1241_v16 = vpop.f32.mrb[4].mxu1 }
 0x240   :  { %v348_v17 = vpop.f32.mrb[5].mxu1  ;;  %v388_v23 = vmul.f32 %v1241_v16, %v2114_v22  ;;  %v711_v16 = vld [vmem:[#allocation11 + $0x58] sm:$0xff] }
 0x241   :  { %v387_v2 = vmul.f32 %v2110_v20, %v348_v17  ;;  %v1531_v17 = vpack.c.bf16 %v606_v13, %v605_v12  ;;  %v821_v12 = vld [vmem:[#allocation13 + $0x8] sm:$0xff] }
 0x243   :  { %v1244_v18 = vpop.f32.mrb[6].mxu1 }
 0x244   :  { %v358_v19 = vpop.f32.mrb[7].mxu1  ;;  %v390_v27 = vmul.f32 %v1244_v18, %v2121_v25  ;;  %v607_v18 = vld [vmem:[#allocation10 + $0x60] sm:$0xff] }
 0x245   :  { %v389_v29 = vmul.f32 %v2112_v21, %v358_v19  ;;  %v608_v19 = vld [vmem:[#allocation10 + $0x68] sm:$0xff] }
 0x25f   :  { %v1279_v5 = vpop.f32.mrb[8].mxu1 }
 0x260   :  { %v493_v0 = vadd.f32 %v1279_v5, %v388_v23  ;;  %v473_v24 = vpop.f32.mrb[9].mxu1  ;;  %v1563_v23 = vpack.c.bf16 %v711_v16, %v710_v15  ;;  %v713_v5 = vld [vmem:[#allocation11 + $0x68] sm:$0xff] }
 0x261   :  { %v492_v26 = vadd.f32 %v473_v24, %v387_v2  ;;  %v712_v2 = vld [vmem:[#allocation11 + $0x60] sm:$0xff]  ;;  %v610_v24 = vld [vmem:[#allocation10 + $0x78] sm:$0xff] }
 0x262   :  { %v504_v28 = vadd.f32 %v1062_v6, %v493_v0  ;;  %v609_v0 = vld [vmem:[#allocation10 + $0x70] sm:$0xff] }
 0x263   :  { %v503_v30 = vadd.f32 %v1062_v6, %v492_v26  ;;  %v1282_v31 = vpop.f32.mrb[10].mxu1  ;;  %v1567_v26 = vpack.c.bf16 %v713_v5, %v712_v2 }
 0x264   :  { %v2125_v34 = vmax.f32 %v504_v28, 0.0  ;;  %v495_v35 = vadd.f32 %v1282_v31, %v390_v27  ;;  %v483_v36 = vpop.f32.mrb[11].mxu1  ;;  %v714_v27 = vld [vmem:[#allocation11 + $0x70] sm:$0xff]  ;;  %v715_v28 = vld [vmem:[#allocation11 + $0x78] sm:$0xff]  ;;  %v836_v31 = vld [vmem:[#allocation14] sm:$0xff] }
 0x265   :  { %v2127_v37 = vmax.f32 %v503_v30, 0.0  ;;  %v494_v38 = vadd.f32 %v483_v36, %v389_v29  ;;  %v1539_v29 = vpack.c.bf16 %v610_v24, %v609_v0  ;;  %v1571_v30 = vpack.c.bf16 %v715_v28, %v714_v27  ;;  %v839_v36 = vld [vmem:[#allocation14 + $0x18] sm:$0xff]  ;;  %v822_v27 = vld [vmem:[#allocation13 + $0x10] sm:$0xff] }
 0x266   :  { %v506_v39 = vadd.f32 %v1062_v6, %v495_v35  ;;  %v1575_v33 = vpack.c.bf16 %v837_v32, %v836_v31  ;;  %v838_v35 = vld [vmem:[#allocation14 + $0x10] sm:$0xff]  ;;  %v823_v28 = vld [vmem:[#allocation13 + $0x18] sm:$0xff] }
 0x267   :  { %v505_v42 = vadd.f32 %v1062_v6, %v494_v38  ;;  %v511_v43 = vpack.c.bf16 %v2125_v34, %v2127_v37  ;;  %v1535_v6 = vpack.c.bf16 %v608_v19, %v607_v18  ;;  %v1579_v40 = vpack.c.bf16 %v839_v36, %v838_v35  ;;  %v824_v35 = vld [vmem:[#allocation13 + $0x20] sm:$0xff]  ;;  %v825_v36 = vld [vmem:[#allocation13 + $0x28] sm:$0xff] }
 0x268   :  { %v2131_v47 = vmax.f32 %v506_v39, 0.0  ;;  %v1611_v32 = vpack.c.bf16 %v823_v28, %v822_v27 }
 0x269   :  { %v2133_v48 = vmax.f32 %v505_v42, 0.0  ;;  %1284 = vmatpush3.bf16.msra.mxu0 %v511_v43  ;;  %v840_v42 = vld [vmem:[#allocation14 + $0x20] sm:$0xff]  ;;  %v841_v43 = vld [vmem:[#allocation14 + $0x28] sm:$0xff] }
 0x26a   :  { %1512 = vmatprep.subr.bf16.mxu0 %v1511_v41 }
 0x26b   :  { %v512_v51 = vpack.c.bf16 %v2131_v47, %v2133_v48 }
 0x26c   :  { %1286 = vmatmul.mubr.msk.bf16.vlgmr.msra.gmra.mrb[4].mxu0 %vm164_vm1, %v2086_v4  ;;  %v1551_v4 = vpack.c.bf16 %v705_v58, %v704_v57  ;;  %v846_v58 = vld [vmem:[#allocation14 + $0x50] sm:$0xff] }
 0x26d   :  { %1290 = vmatpush3.bf16.msra.mxu1 %v512_v51  ;;  %1514 = vmatpush3.bf16.msra.mxu0 %v1511_v41  ;;  %v842_v51 = vld [vmem:[#allocation14 + $0x30] sm:$0xff] }
 0x26e   :  { %1544 = vmatprep.subr.bf16.mxu1 %v1543_v49  ;;  %1516 = vmatprep.subr.bf16.mxu0 %v1515_v50  ;;  %v1587_v54 = vpack.c.bf16 %v843_v52, %v842_v51  ;;  %v833_v51 = vld [vmem:[#allocation13 + $0x68] sm:$0xff] }
 0x270   :  { %1292 = vmatmul.mubr.msk.bf16.vlgmr.msra.gmra.mrb[12].mxu1 %vm164_vm1, %v2094_v10  ;;  %v709_v10 = vld [vmem:[#allocation11 + $0x48] sm:$0xff] }
 0x271   :  { %1546 = vmatpush3.bf16.msra.mxu1 %v1543_v49  ;;  %1365 = vmatprep.mubr.f32.mxu1 %v2127_v37  ;;  %v1559_v14 = vpack.c.bf16 %v709_v10, %v708_v1  ;;  %v1583_v49 = vpack.c.bf16 %v841_v43, %v840_v42  ;;  %v851_v1 = vld [vmem:[#allocation14 + $0x78] sm:$0xff]  ;;  %v828_v42 = vld [vmem:[#allocation13 + $0x40] sm:$0xff]  ;;  %v829_v43 = vld [vmem:[#allocation13 + $0x48] sm:$0xff] }
 0x272   :  { %1548 = vmatprep.subr.bf16.mxu1 %v1547_v56  ;;  %1518 = vmatpush3.bf16.msra.mxu0 %v1515_v50 }
 0x273   :  { %1520 = vmatprep.subr.bf16.mxu0 %v1519_v59 }
 0x275   :  { %1550 = vmatpush3.bf16.msra.mxu1 %v1547_v56  ;;  %v845_v56 = vld [vmem:[#allocation14 + $0x48] sm:$0xff] }
 0x276   :  { %1552 = vmatprep.subr.bf16.mxu1 %v1551_v4  ;;  %1522 = vmatpush3.bf16.msra.mxu0 %v1519_v59  ;;  %v1591_v57 = vpack.c.bf16 %v845_v56, %v844_v55  ;;  %v847_v59 = vld [vmem:[#allocation14 + $0x58] sm:$0xff]  ;;  %v1066_v55 = vld [vmem:[%s2184_s10] ss:$0 sm:$0xff] }
 0x277   :  { %1524 = vmatprep.subr.bf16.mxu0 %v1523_v3  ;;  %v1595_v60 = vpack.c.bf16 %v847_v59, %v846_v58 }
 0x279   :  { %1554 = vmatpush3.bf16.msra.mxu1 %v1551_v4 }
 0x27a   :  { %1556 = vmatprep.subr.bf16.mxu1 %v1555_v9  ;;  %1526 = vmatpush3.bf16.msra.mxu0 %v1523_v3  ;;  %v848_v3 = vld [vmem:[#allocation14 + $0x60] sm:$0xff] }
 0x27b   :  { %1528 = vmatprep.subr.bf16.mxu0 %v1527_v11  ;;  %v1599_v8 = vpack.c.bf16 %v849_v7, %v848_v3 }
 0x27d   :  { %1558 = vmatpush3.bf16.msra.mxu1 %v1555_v9  ;;  %v850_v9 = vld [vmem:[#allocation14 + $0x70] sm:$0xff] }
 0x27e   :  { %1560 = vmatprep.subr.bf16.mxu1 %v1559_v14  ;;  %1530 = vmatpush3.bf16.msra.mxu0 %v1527_v11  ;;  %v1603_v10 = vpack.c.bf16 %v851_v1, %v850_v9  ;;  %v820_v11 = vld [vmem:[#allocation13] sm:$0xff] }
 0x27f   :  { %1532 = vmatprep.subr.bf16.mxu0 %v1531_v17  ;;  %v1607_v13 = vpack.c.bf16 %v821_v12, %v820_v11 }
 0x281   :  { %1562 = vmatpush3.bf16.msra.mxu1 %v1559_v14 }
 0x282   :  { %1564 = vmatprep.subr.bf16.mxu1 %v1563_v23  ;;  %1534 = vmatpush3.bf16.msra.mxu0 %v1531_v17  ;;  %v1065_v17 = vld [vmem:[%s2181_s7] ss:$0 sm:$0xff] }
 0x283   :  { %1536 = vmatprep.subr.bf16.mxu0 %v1535_v6 }
 0x285   :  { %1566 = vmatpush3.bf16.msra.mxu1 %v1563_v23 }
 0x286   :  { %1568 = vmatprep.subr.bf16.mxu1 %v1567_v26  ;;  %1538 = vmatpush3.bf16.msra.mxu0 %v1535_v6 }
 0x287   :  { %1540 = vmatprep.subr.bf16.mxu0 %v1539_v29 }
 0x289   :  { %1570 = vmatpush3.bf16.msra.mxu1 %v1567_v26 }
 0x28a   :  { %1572 = vmatprep.subr.bf16.mxu1 %v1571_v30  ;;  %1542 = vmatpush3.bf16.msra.mxu0 %v1539_v29 }
 0x28b   :  { %1576 = vmatprep.subr.bf16.mxu0 %v1575_v33 }
 0x28d   :  { %1574 = vmatpush3.bf16.msra.mxu1 %v1571_v30 }
 0x290   :  { %1366 = vmatmul.mubr.f32.vlgmr.msra.gmra.mrb[16].mxu1 %v2125_v34 }
 0x291   :  { %1368 = vmatprep.mubr.f32.mxu1 %v2133_v48 }
 0x294   :  { %1369 = vmatmul.mubr.f32.gmra.mrb[18].mxu1 %v2131_v47 }
 0x33f   :  { %v547_v38 = vpop.f32.mrb[4].mxu0 }
 0x340   :  { %v1287_v39 = vpop.f32.mrb[5].mxu0  ;;  %1327 = vmatprep.mubr.f32.mxu0 %v547_v38 }
 0x341   :  { %v550_v41 = vpop.f32.mrb[6].mxu0  ;;  %v1615_v39 = vpack.c.bf16 %v825_v36, %v824_v35 }
 0x342   :  { %1328 = vmatmul.mubr.f32.vlgmr.msra.gmra.mrb[8].mxu0 %v550_v41  ;;  %v1288_v44 = vpop.f32.mrb[7].mxu0 }
 0x343   :  { %v588_v45 = vpop.f32.mrb[12].mxu1  ;;  %1578 = vmatpush3.bf16.msra.mxu0 %v1575_v33  ;;  %v1623_v44 = vpack.c.bf16 %v829_v43, %v828_v42 }
 0x344   :  { %v1293_v46 = vpop.f32.mrb[13].mxu1  ;;  %1330 = vmatprep.mubr.f32.mxu0 %v588_v45  ;;  %1580 = vmatprep.subr.bf16.mxu0 %v1579_v40  ;;  %v830_v45 = vld [vmem:[#allocation13 + $0x50] sm:$0xff] }
 0x345   :  { %v591_v50 = vpop.f32.mrb[14].mxu1  ;;  %v831_v46 = vld [vmem:[#allocation13 + $0x58] sm:$0xff] }
 0x346   :  { %1331 = vmatmul.mubr.f32.gmra.mrb[10].mxu0 %v591_v50  ;;  %v1294_v53 = vpop.f32.mrb[15].mxu1  ;;  %v832_v50 = vld [vmem:[#allocation13 + $0x60] sm:$0xff] }
 0x347   :  { %1582 = vmatpush3.bf16.msra.mxu0 %v1579_v40  ;;  %v827_v40 = vld [vmem:[#allocation13 + $0x38] sm:$0xff]  ;;  %v1631_v52 = vpack.c.bf16 %v833_v51, %v832_v50  ;;  %v834_v53 = vld [vmem:[#allocation13 + $0x70] sm:$0xff] }
 0x348   :  { %1584 = vmatprep.subr.bf16.mxu0 %v1583_v49 }
 0x34b   :  { %1586 = vmatpush3.bf16.msra.mxu0 %v1583_v49  ;;  %v1627_v49 = vpack.c.bf16 %v831_v46, %v830_v45 }
 0x34c   :  { %1588 = vmatprep.subr.bf16.mxu0 %v1587_v54 }
 0x34f   :  { %1590 = vmatpush3.bf16.msra.mxu0 %v1587_v54  ;;  %v835_v54 = vld [vmem:[#allocation13 + $0x78] sm:$0xff] }
 0x350   :  { %1592 = vmatprep.subr.bf16.mxu0 %v1591_v57 }
 0x353   :  { %1594 = vmatpush3.bf16.msra.mxu0 %v1591_v57 }
 0x354   :  { %1596 = vmatprep.subr.bf16.mxu0 %v1595_v60 }
 0x357   :  { %1598 = vmatpush3.bf16.msra.mxu0 %v1595_v60 }
 0x358   :  { %1600 = vmatprep.subr.bf16.mxu0 %v1599_v8 }
 0x35b   :  { %1602 = vmatpush3.bf16.msra.mxu0 %v1599_v8 }
 0x35c   :  { %1604 = vmatprep.subr.bf16.mxu0 %v1603_v10 }
 0x35f   :  { %1606 = vmatpush3.bf16.msra.mxu0 %v1603_v10 }
 0x360   :  { %1608 = vmatprep.subr.bf16.mxu0 %v1607_v13 }
 0x363   :  { %v1367_v61 = vpop.f32.mrb[16].mxu1 }
 0x364   :  { %v782_v4 = vpop.f32.mrb[17].mxu1 }
 0x367   :  { %v1370_v62 = vpop.f32.mrb[18].mxu1 }
 0x368   :  { %v792_v63 = vpop.f32.mrb[19].mxu1 }
 0x415   :  { %v1329_v14 = vpop.f32.mrb[8].mxu0 }
 0x416   :  { %v697_v15 = vmul.f32 %v1329_v14, %v2114_v22  ;;  %v677_v16 = vpop.f32.mrb[9].mxu0 }
 0x417   :  { %v696_v18 = vmul.f32 %v677_v16, %v2110_v20 }
 0x418   :  { %v802_v19 = vadd.f32 %v1367_v61, %v697_v15 }
 0x419   :  { %v801_v23 = vadd.f32 %v782_v4, %v696_v18  ;;  %v1332_v2 = vpop.f32.mrb[10].mxu0 }
 0x41a   :  { %v813_v5 = vadd.f32 %v1065_v17, %v802_v19  ;;  %v699_v6 = vmul.f32 %v1332_v2, %v2121_v25  ;;  %v687_v0 = vpop.f32.mrb[11].mxu0 }
 0x41b   :  { %v698_v24 = vmul.f32 %v687_v0, %v2112_v21  ;;  %v812_v26 = vadd.f32 %v1065_v17, %v801_v23  ;;  %v826_v21 = vld [vmem:[#allocation13 + $0x30] sm:$0xff] }
 0x41c   :  { %v804_v22 = vadd.f32 %v1370_v62, %v699_v6  ;;  %v817_v31 = vmax.f32 %v813_v5, 0.0  ;;  %v1619_v41 = vpack.c.bf16 %v827_v40, %v826_v21 }
 0x41d   :  { %v803_v29 = vadd.f32 %v792_v63, %v698_v24  ;;  %v816_v30 = vmax.f32 %v812_v26, 0.0 }
 0x41e   :  { %v815_v33 = vadd.f32 %v1065_v17, %v804_v22 }
 0x41f   :  { %1403 = vmatprep.mubr.f32.mxu0 %v816_v30  ;;  %v814_v20 = vadd.f32 %v1065_v17, %v803_v29 }
 0x420   :  { %1404 = vmatmul.mubr.f32.vlgmr.msra.gmra.mrb[12].mxu0 %v817_v31  ;;  %v819_v25 = vmax.f32 %v815_v33, 0.0 }
 0x421   :  { %1610 = vmatpush3.bf16.msra.mxu0 %v1607_v13  ;;  %v818_v38 = vmax.f32 %v814_v20, 0.0 }
 0x422   :  { %1612 = vmatprep.subr.bf16.mxu0 %v1611_v32 }
 0x423   :  { %1406 = vmatprep.mubr.f32.mxu0 %v818_v38 }
 0x424   :  { %1407 = vmatmul.mubr.f32.gmra.mrb[14].mxu0 %v819_v25 }
 0x425   :  { %1614 = vmatpush3.bf16.msra.mxu0 %v1611_v32  ;;  %1441 = vmatprep.mubr.f32.mxu0 %v2127_v37  ;;  %v1635_v37 = vpack.c.bf16 %v835_v54, %v834_v53 }
 0x426   :  { %1616 = vmatprep.subr.bf16.mxu0 %v1615_v39 }
 0x429   :  { %1618 = vmatpush3.bf16.msra.mxu0 %v1615_v39 }
 0x42a   :  { %1620 = vmatprep.subr.bf16.mxu0 %v1619_v41 }
 0x42d   :  { %1622 = vmatpush3.bf16.msra.mxu0 %v1619_v41 }
 0x42e   :  { %1624 = vmatprep.subr.bf16.mxu0 %v1623_v44 }
 0x431   :  { %1626 = vmatpush3.bf16.msra.mxu0 %v1623_v44 }
 0x432   :  { %1628 = vmatprep.subr.bf16.mxu0 %v1627_v49 }
 0x435   :  { %1630 = vmatpush3.bf16.msra.mxu0 %v1627_v49 }
 0x436   :  { %1632 = vmatprep.subr.bf16.mxu0 %v1631_v52 }
 0x439   :  { %1634 = vmatpush3.bf16.msra.mxu0 %v1631_v52 }
 0x43a   :  { %1636 = vmatprep.subr.bf16.mxu0 %v1635_v37 }
 0x43d   :  { %1638 = vmatpush3.bf16.msra.mxu0 %v1635_v37 }
 0x440   :  { %1442 = vmatmul.mubr.f32.vlgmr.msra.gmra.mrb[12].mxu0 %v2125_v34 }
 0x441   :  { %1444 = vmatprep.mubr.f32.mxu0 %v2133_v48 }
 0x444   :  { %1445 = vmatmul.mubr.f32.gmra.mrb[14].mxu0 %v2131_v47 }
 0x513   :  { %v1443_v56 = vpop.f32.mrb[12].mxu0 }
 0x514   :  { %v1030_v57 = vadd.f32 %v1443_v56, %v1066_v55  ;;  %v1003_v58 = vpop.f32.mrb[13].mxu0 }
 0x515   :  { %v1029_v59 = vadd.f32 %v1066_v55, %v1003_v58 }
 0x516   :  { %1034 = vst [vmem:[#allocation16 + $0x8] sm:$0xff] %v1030_v57 }
 0x517   :  { %1033 = vst [vmem:[#allocation16] sm:$0xff] %v1029_v59  ;;  %v1446_v60 = vpop.f32.mrb[14].mxu0 }
 0x518   :  { %v1032_v61 = vadd.f32 %v1446_v60, %v1066_v55  ;;  %v1013_v4 = vpop.f32.mrb[15].mxu0 }
 0x519   :  { %v1031_v34 = vadd.f32 %v1066_v55, %v1013_v4 }
 0x51a   :  { %1036 = vst [vmem:[#allocation16 + $0x18] sm:$0xff] %v1032_v61 }
 0x51b   :  { %1035 = vst [vmem:[#allocation16 + $0x10] sm:$0xff] %v1031_v34 }
 0x51c   :  { %1858 = shalt.err (!%p1855_p12)
}
 0x51d   :  { %s1859_s21 = scalar_lea.hbm %s2185_s11, 512 }
 0x51e   :  { %p1860_p13 = scmp.ne.s32.totalorder %s2185_s11, %s1859_s21  ;;  %p1863_p0 = scmp.lt.u32.totalorder %s1859_s21, %s2185_s11 }
 0x520   :  { %p1865_p1 = pnand %p1863_p0, %p1860_p13 }
 0x522   :  { %1868 = shalt.err (!%p1865_p1)
}
 0x523   :  { %1048 = dma.vmem_to_hbm [thread:$0]  %s1043_s3, 512, %s2185_s11, [#allocation4], %s1886_s18, %s1886_s18, %s1887_s24  }
 0x524   :  { %1879 = dma.done.wait [#allocation4], 512  }
 0x525   :  { %1880 = vsyncadd [#allocation4], 4294966784 }
 0x526   :  { %1052 = vsyncpa [#allocation3], 1 }
 0x527   :  { %1053 = vsyncpa [#allocation6], 1 }
 0x528   :  { %1054 = vsyncpa [#allocation9], 1 }
 0x529   :  { %1055 = vsyncpa [#allocation12], 1 }
 0x52a   :  { %1056 = vsyncpa [#allocation15], 1 }
 0x52b   :  { %1057 = vsyncpa [#allocation4], 1 }

</bundles_post_ra>
